<compile_context>
chip_gen: v6e
topology: v6e:2x2x1
jax: 0.10.0
libtpu: 0.0.40
codegen_flags: <defaults>
</compile_context>

<pallas_src>
import jax
import jax.numpy as jnp
from jax.experimental import pallas as pl
from jax.experimental.pallas import tpu as pltpu

# Model / problem sizes (consistent with the module's constructor args).
VOCAB = 32        # vocab_size
EMB = 16          # embedding_dim
HID = 32          # hidden_dim
OUT = 1           # output_dim
LAYERS = 2        # n_layers
B = 2             # batch
T = 8             # sequence length
BP = 8            # batch padded to a full sublane tile

H2 = 2 * HID      # 64   merged state width  (fwd | bwd)
H6 = 6 * HID      # 192  sigmoid-gate columns (i|i, f|f, o|o)
G8 = 8 * HID      # 256  merged gate width [i_f,i_b,f_f,f_b,o_f,o_b,g_f,g_b]
IN0 = 2 * EMB     # 32   layer-0 merged input width (x[t] | x[T-1-t])


def _bilstm_classifier_kernel(
    x0_ref,      # [T*BP, 2*EMB]  (x[t] | x[T-1-t]) flat time-major
    mask_ref,    # [T*BP, 2H]     1.0 while the fwd/bwd timestep of that row is valid
    slab0_ref,   # [104, 256]     rows 0:32 W_x0 | row 32 bias0 | rows 40:104 W_hh0
    slab1_ref,   # [200, 256]     rows 0:64 W1_M | 64:128 W1_R | row 128 bias1 | 136:200 W_hh1
    fc_ref,      # [72, OUT]      rows 0:64 fc_w.T | row 64 fc_b
    out_ref,     # [BP, OUT]
    mseq_ref,    # [T*BP, 2H]     scratch: merged layer-0 h stored at row s
    rseq_ref,    # [T*BP, 2H]     scratch: merged layer-0 h stored at row T-1-s
):
    f32 = jnp.float32

    def sigm(x):
        # EUP-only sigmoid: exp + approximate reciprocal (no VPU divide).
        return pl.reciprocal(1.0 + jnp.exp(-x), approx=True)

    def run_layer(gx, w_hh, store_seq):
        # Merged recurrence: lanes 0:H are the fwd direction at timestep s,
        # lanes H:2H are the bwd direction at timestep T-1-s.
        h = jnp.zeros((BP, H2), f32)
        c = jnp.zeros((BP, H2), f32)
        for s in range(T):                                   # fully unrolled, T = 8
            valid = mask_ref[pl.ds(s * BP, BP), :] > 0.5     # [BP, 2H] bool (off-chain)
            gates = gx[s * BP:(s + 1) * BP, :] + jnp.dot(
                h, w_hh, preferred_element_type=f32)         # [BP, 256] one MXU push
            sg = sigm(gates[:, :H6])                         # i|f|o both dirs
            gg = jnp.tanh(gates[:, H6:])                     # g  both dirs
            i_g = sg[:, :H2]
            f_g = sg[:, H2:2 * H2]
            o_g = sg[:, 2 * H2:]
            c_new = f_g * c + i_g * gg
            h_new = o_g * jnp.tanh(c_new)
            # packed-sequence semantics: freeze state once t >= length (one vselect)
            h = jnp.where(valid, h_new, h)
            c = jnp.where(valid, c_new, c)
            if store_seq:
                # merged h at step s = [h_f[s] | h_b[T-1-s]]; storing it at rows s and
                # T-1-s gives exactly the forward-/reverse-time operand pair layer 1 needs.
                mseq_ref[pl.ds(s * BP, BP), :] = h
                rseq_ref[pl.ds((T - 1 - s) * BP, BP), :] = h
        return h

    # ---- layer 0: one bulk input projection, gx kept as a value (16 vregs) ----
    w_x0 = slab0_ref[pl.ds(0, IN0), :]                       # [32, 256]
    b0 = slab0_ref[pl.ds(IN0, 1), :]                         # [1, 256]
    whh0 = slab0_ref[pl.ds(IN0 + 8, H2), :]                  # [64, 256] block-diag
    gx0 = jnp.dot(x0_ref[...], w_x0, preferred_element_type=f32) + b0   # [T*BP, 256]
    run_layer(gx0, whh0, store_seq=True)

    # ---- layer 1 (inter-layer dropout is inference-mode identity) ----
    w1_m = slab1_ref[pl.ds(0, H2), :]                        # [64, 256] acts on mseq
    w1_r = slab1_ref[pl.ds(H2, H2), :]                       # [64, 256] acts on rseq
    b1 = slab1_ref[pl.ds(2 * H2, 1), :]                      # [1, 256]
    whh1 = slab1_ref[pl.ds(2 * H2 + 8, H2), :]               # [64, 256] block-diag
    gx1 = (jnp.dot(mseq_ref[...], w1_m, preferred_element_type=f32)
           + jnp.dot(rseq_ref[...], w1_r, preferred_element_type=f32)
           + b1)                                             # [T*BP, 256]
    h_fin = run_layer(gx1, whh1, store_seq=False)            # [BP, 2H] = [h_f | h_b]

    # ---- hidden = cat(hidden[-2], hidden[-1]); fc; sigmoid — single dot ----
    fcw = fc_ref[pl.ds(0, H2), :]                            # [64, OUT]
    fcb = fc_ref[pl.ds(H2, 1), :]                            # [1, OUT]
    dense = jnp.dot(h_fin, fcw, preferred_element_type=f32) + fcb
    out_ref[...] = jax.nn.sigmoid(dense)


# ------------------------- one-time weight preparation -------------------------

def _split_ifgo(w):
    """Split a trailing 4H axis in torch's (i, f, g, o) gate order."""
    return (w[..., :HID], w[..., HID:2 * HID],
            w[..., 2 * HID:3 * HID], w[..., 3 * HID:4 * HID])


def _place(w4h, direction):
    """Place a per-direction [rows, 4H] block into the merged [rows, 8H] layout
    [i_f,i_b | f_f,f_b | o_f,o_b | g_f,g_b]; the other direction's columns are zero."""
    i, f, g, o = _split_ifgo(w4h)
    z = jnp.zeros_like(i)
    if direction == 0:
        blocks = (i, z, f, z, o, z, g, z)
    else:
        blocks = (z, i, z, f, z, o, z, g)
    return jnp.concatenate(blocks, axis=-1)


def prepare_weights(params):
    """Hoisted per-call weight prep: computed ONCE, outputs are in final kernel layout."""
    def dir_parts(layer, d):
        w_ih, w_hh, b_ih, b_hh = params["lstm"][(layer, d)]
        return w_ih.T, w_hh.T, (b_ih + b_hh)[None, :]

    # ----- layer 0 slab: [W_x0 (32) | bias (8) | W_hh block-diag (64)] x 256 -----
    wih0f, whh0f, bias0f = dir_parts(0, 0)
    wih0b, whh0b, bias0b = dir_parts(0, 1)
    w0 = jnp.concatenate([_place(wih0f, 0), _place(wih0b, 1)], axis=0)       # [2*EMB, 256]
    b0 = _place(bias0f, 0) + _place(bias0b, 1)                               # [1, 256]
    whh0 = jnp.concatenate([_place(whh0f, 0), _place(whh0b, 1)], axis=0)     # [2H, 256]
    slab0 = jnp.concatenate(
        [w0, jnp.pad(b0, ((0, 7), (0, 0))), whh0], axis=0).astype(jnp.float32)

    # ----- layer 1 slab: [W1_M (64) | W1_R (64) | bias (8) | W_hh block-diag (64)] -----
    # mseq row s = [h0_f[s] | h0_b[T-1-s]],  rseq row s = [h0_f[T-1-s] | h0_b[s]]
    wih1f, whh1f, bias1f = dir_parts(1, 0)     # [2H, 4H]
    wih1b, whh1b, bias1b = dir_parts(1, 1)
    w1_m = jnp.concatenate([_place(wih1f[:HID], 0),      # h0_f[s]     -> fwd gates
                            _place(wih1b[HID:], 1)],     # h0_b[T-1-s] -> bwd gates
                           axis=0)                                           # [2H, 256]
    w1_r = jnp.concatenate([_place(wih1b[:HID], 1),      # h0_f[T-1-s] -> bwd gates
                            _place(wih1f[HID:], 0)],     # h0_b[s]     -> fwd gates
                           axis=0)                                           # [2H, 256]
    b1 = _place(bias1f, 0) + _place(bias1b, 1)
    whh1 = jnp.concatenate([_place(whh1f, 0), _place(whh1b, 1)], axis=0)
    slab1 = jnp.concatenate(
        [w1_m, w1_r, jnp.pad(b1, ((0, 7), (0, 0))), whh1], axis=0).astype(jnp.float32)

    # ----- fc slab: [fc_w.T (64) | fc_b (8)] x OUT -----
    fc_slab = jnp.concatenate(
        [params["fc_w"].T, jnp.pad(params["fc_b"][None, :], ((0, 7), (0, 0)))],
        axis=0).astype(jnp.float32)

    return {"embedding": params["embedding"].astype(jnp.float32),
            "slab0": slab0, "slab1": slab1, "fc": fc_slab}


# --------------------------------- forward ---------------------------------

@jax.jit
def classifier_forward(text, text_lengths, prepped):
    # Per-input glue only: embedding gather, batch padding, fwd|rev packing, mask.
    emb = prepped["embedding"][text]                                   # [B, T, EMB]
    emb_tm = jnp.transpose(emb, (1, 0, 2))                             # [T, B, EMB]
    emb_tm = jnp.pad(emb_tm, ((0, 0), (0, BP - B), (0, 0)))            # pad batch -> 8
    x0 = jnp.concatenate([emb_tm, emb_tm[::-1]], axis=-1)              # [T, BP, 2*EMB]
    x0 = x0.reshape(T * BP, IN0).astype(jnp.float32)

    lengths_p = jnp.concatenate(
        [text_lengths.astype(jnp.int32), jnp.zeros((BP - B,), jnp.int32)])
    t_idx = jnp.arange(T, dtype=jnp.int32)[:, None]
    valid_f = (t_idx < lengths_p[None, :]).astype(jnp.float32)         # [T, BP] t = s
    valid_b = valid_f[::-1]                                            # [T, BP] t = T-1-s
    mask = jnp.concatenate(
        [jnp.broadcast_to(valid_f[:, :, None], (T, BP, HID)),
         jnp.broadcast_to(valid_b[:, :, None], (T, BP, HID))],
        axis=-1).reshape(T * BP, H2)                                   # [T*BP, 2H]

    out_p = pl.pallas_call(
        _bilstm_classifier_kernel,
        out_shape=jax.ShapeDtypeStruct((BP, OUT), jnp.float32),
        in_specs=[pl.BlockSpec(memory_space=pltpu.MemorySpace.VMEM)] * 5,
        out_specs=pl.BlockSpec(memory_space=pltpu.MemorySpace.VMEM),
        scratch_shapes=[
            pltpu.VMEM((T * BP, H2), jnp.float32),   # layer-0 merged h, forward-time rows
            pltpu.VMEM((T * BP, H2), jnp.float32),   # layer-0 merged h, reverse-time rows
        ],
    )(x0, mask, prepped["slab0"], prepped["slab1"], prepped["fc"])
    return out_p[:B]                                                   # drop batch padding


# ------------------------- synthetic params & reference -------------------------

def init_params(key):
    """Deterministic synthetic parameters matching the nn.Module shapes."""
    k = 1.0 / jnp.sqrt(jnp.float32(HID))
    params = {}
    key, sub = jax.random.split(key)
    params["embedding"] = jax.random.normal(sub, (VOCAB, EMB), jnp.float32) * 0.1
    lstm = {}
    for layer in range(LAYERS):
        in_dim = EMB if layer == 0 else 2 * HID
        for direction in range(2):
            key, k1, k2, k3, k4 = jax.random.split(key, 5)
            w_ih = jax.random.uniform(k1, (4 * HID, in_dim), jnp.float32, -k, k)
            w_hh = jax.random.uniform(k2, (4 * HID, HID), jnp.float32, -k, k)
            b_ih = jax.random.uniform(k3, (4 * HID,), jnp.float32, -k, k)
            b_hh = jax.random.uniform(k4, (4 * HID,), jnp.float32, -k, k)
            lstm[(layer, direction)] = (w_ih, w_hh, b_ih, b_hh)
    params["lstm"] = lstm
    key, k1, k2 = jax.random.split(key, 3)
    params["fc_w"] = jax.random.uniform(k1, (OUT, 2 * HID), jnp.float32, -k, k)
    params["fc_b"] = jax.random.uniform(k2, (OUT,), jnp.float32, -k, k)
    return params


def _reference_forward(text, text_lengths, params):
    """Pure-JAX reference mirroring torch's packed biLSTM -> fc -> sigmoid."""
    emb = params["embedding"][text].astype(jnp.float32)                # [B, T, EMB]
    lengths = text_lengths.astype(jnp.int32)

    def run_dir(x, w_ih, w_hh, b_ih, b_hh, reverse):
        Bn, Tn, _ = x.shape
        h = jnp.zeros((Bn, HID), jnp.float32)
        c = jnp.zeros((Bn, HID), jnp.float32)
        outs = [None] * Tn
        order = range(Tn - 1, -1, -1) if reverse else range(Tn)
        for t in order:
            gates = x[:, t] @ w_ih.T + b_ih + h @ w_hh.T + b_hh       # (i,f,g,o)
            i = jax.nn.sigmoid(gates[:, :HID])
            f = jax.nn.sigmoid(gates[:, HID:2 * HID])
            g = jnp.tanh(gates[:, 2 * HID:3 * HID])
            o = jax.nn.sigmoid(gates[:, 3 * HID:])
            c_new = f * c + i * g
            h_new = o * jnp.tanh(c_new)
            valid = (t < lengths)[:, None]
            h = jnp.where(valid, h_new, h)
            c = jnp.where(valid, c_new, c)
            outs[t] = h
        return jnp.stack(outs, axis=1), h

    layer_in = emb
    finals = None
    for layer in range(LAYERS):
        of, hf = run_dir(layer_in, *params["lstm"][(layer, 0)], reverse=False)
        ob, hb = run_dir(layer_in, *params["lstm"][(layer, 1)], reverse=True)
        layer_in = jnp.concatenate([of, ob], axis=-1)
        finals = (hf, hb)
    hidden = jnp.concatenate(finals, axis=-1)                          # [B, 2H]
    dense = hidden @ params["fc_w"].T + params["fc_b"]
    return jax.nn.sigmoid(dense)


if __name__ == "__main__":
    key = jax.random.PRNGKey(0)
    params = init_params(key)
    prepped = prepare_weights(params)          # one-time layout prep (hoisted out of forward)

    key, k_text = jax.random.split(key)
    text = jax.random.randint(k_text, (B, T), 0, VOCAB, dtype=jnp.int32)
    # pack_padded_sequence expects sorted (descending) lengths
    text_lengths = jnp.array([T, 5], dtype=jnp.int32)

    out = classifier_forward(text, text_lengths, prepped)
    out = jax.block_until_ready(out)
    ref = _reference_forward(text, text_lengths, params)

    assert out.shape == (B, OUT)
    assert bool(jnp.all(jnp.isfinite(out)))
    # approx-reciprocal sigmoid in the gates -> allow a small tolerance vs. exact reference
    assert bool(jnp.allclose(out, ref, atol=2e-2, rtol=2e-2)), (out, ref)
    print("KERNEL_OK")
</pallas_src>

<mosaic_0001>
module attributes {stable_mosaic.version = 11 : i64} {
  func.func @_bilstm_classifier_kernel(%arg0: memref<64x32xf32, #tpu.memory_space<vmem>>, %arg1: memref<64x64xf32, #tpu.memory_space<vmem>>, %arg2: memref<104x256xf32, #tpu.memory_space<vmem>>, %arg3: memref<200x256xf32, #tpu.memory_space<vmem>>, %arg4: memref<72x1xf32, #tpu.memory_space<vmem>>, %arg5: memref<8x1xf32, #tpu.memory_space<vmem>>, %arg6: memref<64x64xf32, #tpu.memory_space<vmem>>, %arg7: memref<64x64xf32, #tpu.memory_space<vmem>>) attributes {dimension_semantics = [], scalar_prefetch = 0 : i64, scratch_operands = 2 : i64, tpu.core_type = #tpu.core_type<tc>} {
    %c0 = arith.constant 0 : index
    %c0_0 = arith.constant 0 : index
    %0 = vector.load %arg2[%c0, %c0_0] : memref<104x256xf32, #tpu.memory_space<vmem>>, vector<32x256xf32>
    %c32 = arith.constant 32 : index
    %c0_1 = arith.constant 0 : index
    %1 = vector.load %arg2[%c32, %c0_1] : memref<104x256xf32, #tpu.memory_space<vmem>>, vector<1x256xf32>
    %c40 = arith.constant 40 : index
    %c0_2 = arith.constant 0 : index
    %2 = vector.load %arg2[%c40, %c0_2] : memref<104x256xf32, #tpu.memory_space<vmem>>, vector<64x256xf32>
    %c0_3 = arith.constant 0 : index
    %c0_4 = arith.constant 0 : index
    %3 = vector.load %arg0[%c0_3, %c0_4] : memref<64x32xf32, #tpu.memory_space<vmem>>, vector<64x32xf32>
    %cst = arith.constant dense<0.000000e+00> : vector<64x256xf32>
    %4 = tpu.matmul %3, %0, %cst {dimension_numbers = #tpu.dot_dimension_numbers<[1], [0], [0], [1], [0, 0, 1, 1], [], []>} : vector<64x32xf32>, vector<32x256xf32>, vector<64x256xf32> -> vector<64x256xf32>
    %5 = vector.broadcast %1 : vector<1x256xf32> to vector<64x256xf32>
    %6 = arith.addf %4, %5 : vector<64x256xf32>
    %cst_5 = arith.constant 0.000000e+00 : f32
    %7 = vector.broadcast %cst_5 : f32 to vector<8x64xf32>
    %cst_6 = arith.constant 0.000000e+00 : f32
    %8 = vector.broadcast %cst_6 : f32 to vector<8x64xf32>
    %c0_7 = arith.constant 0 : index
    %c0_8 = arith.constant 0 : index
    %9 = vector.load %arg1[%c0_7, %c0_8] : memref<64x64xf32, #tpu.memory_space<vmem>>, vector<8x64xf32>
    %cst_9 = arith.constant 5.000000e-01 : f32
    %10 = vector.broadcast %cst_9 : f32 to vector<8x64xf32>
    %11 = arith.cmpf ogt, %9, %10 : vector<8x64xf32>
    %12 = vector.extract_strided_slice %6 {offsets = [0, 0], sizes = [8, 256], strides = [1, 1]} : vector<64x256xf32> to vector<8x256xf32>
    %cst_10 = arith.constant dense<0.000000e+00> : vector<8x256xf32>
    %13 = tpu.matmul %7, %2, %cst_10 {dimension_numbers = #tpu.dot_dimension_numbers<[1], [0], [0], [1], [0, 0, 1, 1], [], []>} : vector<8x64xf32>, vector<64x256xf32>, vector<8x256xf32> -> vector<8x256xf32>
    %14 = arith.addf %12, %13 : vector<8x256xf32>
    %15 = vector.extract_strided_slice %14 {offsets = [0, 0], sizes = [8, 192], strides = [1, 1]} : vector<8x256xf32> to vector<8x192xf32>
    %cst_11 = arith.constant 0.000000e+00 : f32
    %16 = vector.broadcast %cst_11 : f32 to vector<8x192xf32>
    %17 = arith.subf %16, %15 : vector<8x192xf32>
    %18 = math.exp %17 : vector<8x192xf32>
    %cst_12 = arith.constant 1.000000e+00 : f32
    %19 = vector.broadcast %cst_12 : f32 to vector<8x192xf32>
    %20 = arith.addf %19, %18 : vector<8x192xf32>
    %21 = tpu.reciprocal %20 {approx = true} : vector<8x192xf32> -> vector<8x192xf32>
    %22 = vector.extract_strided_slice %14 {offsets = [0, 192], sizes = [8, 64], strides = [1, 1]} : vector<8x256xf32> to vector<8x64xf32>
    %23 = math.tanh %22 : vector<8x64xf32>
    %24 = vector.extract_strided_slice %21 {offsets = [0, 0], sizes = [8, 64], strides = [1, 1]} : vector<8x192xf32> to vector<8x64xf32>
    %25 = vector.extract_strided_slice %21 {offsets = [0, 64], sizes = [8, 64], strides = [1, 1]} : vector<8x192xf32> to vector<8x64xf32>
    %26 = vector.extract_strided_slice %21 {offsets = [0, 128], sizes = [8, 64], strides = [1, 1]} : vector<8x192xf32> to vector<8x64xf32>
    %27 = arith.mulf %25, %8 : vector<8x64xf32>
    %28 = arith.mulf %24, %23 : vector<8x64xf32>
    %29 = arith.addf %27, %28 : vector<8x64xf32>
    %30 = math.tanh %29 : vector<8x64xf32>
    %31 = arith.mulf %26, %30 : vector<8x64xf32>
    %32 = arith.select %11, %31, %7 : vector<8x64xi1>, vector<8x64xf32>
    %33 = arith.select %11, %29, %8 : vector<8x64xi1>, vector<8x64xf32>
    %c0_13 = arith.constant 0 : index
    %c0_14 = arith.constant 0 : index
    %34 = vector.load %arg6[%c0_13, %c0_14] : memref<64x64xf32, #tpu.memory_space<vmem>>, vector<8x64xf32>
    tpu.vector_store %arg6[%c0_13, %c0_14], %32 {strides = array<i32>} : memref<64x64xf32, #tpu.memory_space<vmem>>, vector<8x64xf32>,
    %c56 = arith.constant 56 : index
    %c0_15 = arith.constant 0 : index
    %35 = vector.load %arg7[%c56, %c0_15] : memref<64x64xf32, #tpu.memory_space<vmem>>, vector<8x64xf32>
    tpu.vector_store %arg7[%c56, %c0_15], %32 {strides = array<i32>} : memref<64x64xf32, #tpu.memory_space<vmem>>, vector<8x64xf32>,
    %c8 = arith.constant 8 : index
    %c0_16 = arith.constant 0 : index
    %36 = vector.load %arg1[%c8, %c0_16] : memref<64x64xf32, #tpu.memory_space<vmem>>, vector<8x64xf32>
    %cst_17 = arith.constant 5.000000e-01 : f32
    %37 = vector.broadcast %cst_17 : f32 to vector<8x64xf32>
    %38 = arith.cmpf ogt, %36, %37 : vector<8x64xf32>
    %39 = vector.extract_strided_slice %6 {offsets = [8, 0], sizes = [8, 256], strides = [1, 1]} : vector<64x256xf32> to vector<8x256xf32>
    %cst_18 = arith.constant dense<0.000000e+00> : vector<8x256xf32>
    %40 = tpu.matmul %32, %2, %cst_18 {dimension_numbers = #tpu.dot_dimension_numbers<[1], [0], [0], [1], [0, 0, 1, 1], [], []>} : vector<8x64xf32>, vector<64x256xf32>, vector<8x256xf32> -> vector<8x256xf32>
    %41 = arith.addf %39, %40 : vector<8x256xf32>
    %42 = vector.extract_strided_slice %41 {offsets = [0, 0], sizes = [8, 192], strides = [1, 1]} : vector<8x256xf32> to vector<8x192xf32>
    %cst_19 = arith.constant 0.000000e+00 : f32
    %43 = vector.broadcast %cst_19 : f32 to vector<8x192xf32>
    %44 = arith.subf %43, %42 : vector<8x192xf32>
    %45 = math.exp %44 : vector<8x192xf32>
    %cst_20 = arith.constant 1.000000e+00 : f32
    %46 = vector.broadcast %cst_20 : f32 to vector<8x192xf32>
    %47 = arith.addf %46, %45 : vector<8x192xf32>
    %48 = tpu.reciprocal %47 {approx = true} : vector<8x192xf32> -> vector<8x192xf32>
    %49 = vector.extract_strided_slice %41 {offsets = [0, 192], sizes = [8, 64], strides = [1, 1]} : vector<8x256xf32> to vector<8x64xf32>
    %50 = math.tanh %49 : vector<8x64xf32>
    %51 = vector.extract_strided_slice %48 {offsets = [0, 0], sizes = [8, 64], strides = [1, 1]} : vector<8x192xf32> to vector<8x64xf32>
    %52 = vector.extract_strided_slice %48 {offsets = [0, 64], sizes = [8, 64], strides = [1, 1]} : vector<8x192xf32> to vector<8x64xf32>
    %53 = vector.extract_strided_slice %48 {offsets = [0, 128], sizes = [8, 64], strides = [1, 1]} : vector<8x192xf32> to vector<8x64xf32>
    %54 = arith.mulf %52, %33 : vector<8x64xf32>
    %55 = arith.mulf %51, %50 : vector<8x64xf32>
    %56 = arith.addf %54, %55 : vector<8x64xf32>
    %57 = math.tanh %56 : vector<8x64xf32>
    %58 = arith.mulf %53, %57 : vector<8x64xf32>
    %59 = arith.select %38, %58, %32 : vector<8x64xi1>, vector<8x64xf32>
    %60 = arith.select %38, %56, %33 : vector<8x64xi1>, vector<8x64xf32>
    %c8_21 = arith.constant 8 : index
    %c0_22 = arith.constant 0 : index
    %61 = vector.load %arg6[%c8_21, %c0_22] : memref<64x64xf32, #tpu.memory_space<vmem>>, vector<8x64xf32>
    tpu.vector_store %arg6[%c8_21, %c0_22], %59 {strides = array<i32>} : memref<64x64xf32, #tpu.memory_space<vmem>>, vector<8x64xf32>,
    %c48 = arith.constant 48 : index
    %c0_23 = arith.constant 0 : index
    %62 = vector.load %arg7[%c48, %c0_23] : memref<64x64xf32, #tpu.memory_space<vmem>>, vector<8x64xf32>
    tpu.vector_store %arg7[%c48, %c0_23], %59 {strides = array<i32>} : memref<64x64xf32, #tpu.memory_space<vmem>>, vector<8x64xf32>,
    %c16 = arith.constant 16 : index
    %c0_24 = arith.constant 0 : index
    %63 = vector.load %arg1[%c16, %c0_24] : memref<64x64xf32, #tpu.memory_space<vmem>>, vector<8x64xf32>
    %cst_25 = arith.constant 5.000000e-01 : f32
    %64 = vector.broadcast %cst_25 : f32 to vector<8x64xf32>
    %65 = arith.cmpf ogt, %63, %64 : vector<8x64xf32>
    %66 = vector.extract_strided_slice %6 {offsets = [16, 0], sizes = [8, 256], strides = [1, 1]} : vector<64x256xf32> to vector<8x256xf32>
    %cst_26 = arith.constant dense<0.000000e+00> : vector<8x256xf32>
    %67 = tpu.matmul %59, %2, %cst_26 {dimension_numbers = #tpu.dot_dimension_numbers<[1], [0], [0], [1], [0, 0, 1, 1], [], []>} : vector<8x64xf32>, vector<64x256xf32>, vector<8x256xf32> -> vector<8x256xf32>
    %68 = arith.addf %66, %67 : vector<8x256xf32>
    %69 = vector.extract_strided_slice %68 {offsets = [0, 0], sizes = [8, 192], strides = [1, 1]} : vector<8x256xf32> to vector<8x192xf32>
    %cst_27 = arith.constant 0.000000e+00 : f32
    %70 = vector.broadcast %cst_27 : f32 to vector<8x192xf32>
    %71 = arith.subf %70, %69 : vector<8x192xf32>
    %72 = math.exp %71 : vector<8x192xf32>
    %cst_28 = arith.constant 1.000000e+00 : f32
    %73 = vector.broadcast %cst_28 : f32 to vector<8x192xf32>
    %74 = arith.addf %73, %72 : vector<8x192xf32>
    %75 = tpu.reciprocal %74 {approx = true} : vector<8x192xf32> -> vector<8x192xf32>
    %76 = vector.extract_strided_slice %68 {offsets = [0, 192], sizes = [8, 64], strides = [1, 1]} : vector<8x256xf32> to vector<8x64xf32>
    %77 = math.tanh %76 : vector<8x64xf32>
    %78 = vector.extract_strided_slice %75 {offsets = [0, 0], sizes = [8, 64], strides = [1, 1]} : vector<8x192xf32> to vector<8x64xf32>
    %79 = vector.extract_strided_slice %75 {offsets = [0, 64], sizes = [8, 64], strides = [1, 1]} : vector<8x192xf32> to vector<8x64xf32>
    %80 = vector.extract_strided_slice %75 {offsets = [0, 128], sizes = [8, 64], strides = [1, 1]} : vector<8x192xf32> to vector<8x64xf32>
    %81 = arith.mulf %79, %60 : vector<8x64xf32>
    %82 = arith.mulf %78, %77 : vector<8x64xf32>
    %83 = arith.addf %81, %82 : vector<8x64xf32>
    %84 = math.tanh %83 : vector<8x64xf32>
    %85 = arith.mulf %80, %84 : vector<8x64xf32>
    %86 = arith.select %65, %85, %59 : vector<8x64xi1>, vector<8x64xf32>
    %87 = arith.select %65, %83, %60 : vector<8x64xi1>, vector<8x64xf32>
    %c16_29 = arith.constant 16 : index
    %c0_30 = arith.constant 0 : index
    %88 = vector.load %arg6[%c16_29, %c0_30] : memref<64x64xf32, #tpu.memory_space<vmem>>, vector<8x64xf32>
    tpu.vector_store %arg6[%c16_29, %c0_30], %86 {strides = array<i32>} : memref<64x64xf32, #tpu.memory_space<vmem>>, vector<8x64xf32>,
    %c40_31 = arith.constant 40 : index
    %c0_32 = arith.constant 0 : index
    %89 = vector.load %arg7[%c40_31, %c0_32] : memref<64x64xf32, #tpu.memory_space<vmem>>, vector<8x64xf32>
    tpu.vector_store %arg7[%c40_31, %c0_32], %86 {strides = array<i32>} : memref<64x64xf32, #tpu.memory_space<vmem>>, vector<8x64xf32>,
    %c24 = arith.constant 24 : index
    %c0_33 = arith.constant 0 : index
    %90 = vector.load %arg1[%c24, %c0_33] : memref<64x64xf32, #tpu.memory_space<vmem>>, vector<8x64xf32>
    %cst_34 = arith.constant 5.000000e-01 : f32
    %91 = vector.broadcast %cst_34 : f32 to vector<8x64xf32>
    %92 = arith.cmpf ogt, %90, %91 : vector<8x64xf32>
    %93 = vector.extract_strided_slice %6 {offsets = [24, 0], sizes = [8, 256], strides = [1, 1]} : vector<64x256xf32> to vector<8x256xf32>
    %cst_35 = arith.constant dense<0.000000e+00> : vector<8x256xf32>
    %94 = tpu.matmul %86, %2, %cst_35 {dimension_numbers = #tpu.dot_dimension_numbers<[1], [0], [0], [1], [0, 0, 1, 1], [], []>} : vector<8x64xf32>, vector<64x256xf32>, vector<8x256xf32> -> vector<8x256xf32>
    %95 = arith.addf %93, %94 : vector<8x256xf32>
    %96 = vector.extract_strided_slice %95 {offsets = [0, 0], sizes = [8, 192], strides = [1, 1]} : vector<8x256xf32> to vector<8x192xf32>
    %cst_36 = arith.constant 0.000000e+00 : f32
    %97 = vector.broadcast %cst_36 : f32 to vector<8x192xf32>
    %98 = arith.subf %97, %96 : vector<8x192xf32>
    %99 = math.exp %98 : vector<8x192xf32>
    %cst_37 = arith.constant 1.000000e+00 : f32
    %100 = vector.broadcast %cst_37 : f32 to vector<8x192xf32>
    %101 = arith.addf %100, %99 : vector<8x192xf32>
    %102 = tpu.reciprocal %101 {approx = true} : vector<8x192xf32> -> vector<8x192xf32>
    %103 = vector.extract_strided_slice %95 {offsets = [0, 192], sizes = [8, 64], strides = [1, 1]} : vector<8x256xf32> to vector<8x64xf32>
    %104 = math.tanh %103 : vector<8x64xf32>
    %105 = vector.extract_strided_slice %102 {offsets = [0, 0], sizes = [8, 64], strides = [1, 1]} : vector<8x192xf32> to vector<8x64xf32>
    %106 = vector.extract_strided_slice %102 {offsets = [0, 64], sizes = [8, 64], strides = [1, 1]} : vector<8x192xf32> to vector<8x64xf32>
    %107 = vector.extract_strided_slice %102 {offsets = [0, 128], sizes = [8, 64], strides = [1, 1]} : vector<8x192xf32> to vector<8x64xf32>
    %108 = arith.mulf %106, %87 : vector<8x64xf32>
    %109 = arith.mulf %105, %104 : vector<8x64xf32>
    %110 = arith.addf %108, %109 : vector<8x64xf32>
    %111 = math.tanh %110 : vector<8x64xf32>
    %112 = arith.mulf %107, %111 : vector<8x64xf32>
    %113 = arith.select %92, %112, %86 : vector<8x64xi1>, vector<8x64xf32>
    %114 = arith.select %92, %110, %87 : vector<8x64xi1>, vector<8x64xf32>
    %c24_38 = arith.constant 24 : index
    %c0_39 = arith.constant 0 : index
    %115 = vector.load %arg6[%c24_38, %c0_39] : memref<64x64xf32, #tpu.memory_space<vmem>>, vector<8x64xf32>
    tpu.vector_store %arg6[%c24_38, %c0_39], %113 {strides = array<i32>} : memref<64x64xf32, #tpu.memory_space<vmem>>, vector<8x64xf32>,
    %c32_40 = arith.constant 32 : index
    %c0_41 = arith.constant 0 : index
    %116 = vector.load %arg7[%c32_40, %c0_41] : memref<64x64xf32, #tpu.memory_space<vmem>>, vector<8x64xf32>
    tpu.vector_store %arg7[%c32_40, %c0_41], %113 {strides = array<i32>} : memref<64x64xf32, #tpu.memory_space<vmem>>, vector<8x64xf32>,
    %c32_42 = arith.constant 32 : index
    %c0_43 = arith.constant 0 : index
    %117 = vector.load %arg1[%c32_42, %c0_43] : memref<64x64xf32, #tpu.memory_space<vmem>>, vector<8x64xf32>
    %cst_44 = arith.constant 5.000000e-01 : f32
    %118 = vector.broadcast %cst_44 : f32 to vector<8x64xf32>
    %119 = arith.cmpf ogt, %117, %118 : vector<8x64xf32>
    %120 = vector.extract_strided_slice %6 {offsets = [32, 0], sizes = [8, 256], strides = [1, 1]} : vector<64x256xf32> to vector<8x256xf32>
    %cst_45 = arith.constant dense<0.000000e+00> : vector<8x256xf32>
    %121 = tpu.matmul %113, %2, %cst_45 {dimension_numbers = #tpu.dot_dimension_numbers<[1], [0], [0], [1], [0, 0, 1, 1], [], []>} : vector<8x64xf32>, vector<64x256xf32>, vector<8x256xf32> -> vector<8x256xf32>
    %122 = arith.addf %120, %121 : vector<8x256xf32>
    %123 = vector.extract_strided_slice %122 {offsets = [0, 0], sizes = [8, 192], strides = [1, 1]} : vector<8x256xf32> to vector<8x192xf32>
    %cst_46 = arith.constant 0.000000e+00 : f32
    %124 = vector.broadcast %cst_46 : f32 to vector<8x192xf32>
    %125 = arith.subf %124, %123 : vector<8x192xf32>
    %126 = math.exp %125 : vector<8x192xf32>
    %cst_47 = arith.constant 1.000000e+00 : f32
    %127 = vector.broadcast %cst_47 : f32 to vector<8x192xf32>
    %128 = arith.addf %127, %126 : vector<8x192xf32>
    %129 = tpu.reciprocal %128 {approx = true} : vector<8x192xf32> -> vector<8x192xf32>
    %130 = vector.extract_strided_slice %122 {offsets = [0, 192], sizes = [8, 64], strides = [1, 1]} : vector<8x256xf32> to vector<8x64xf32>
    %131 = math.tanh %130 : vector<8x64xf32>
    %132 = vector.extract_strided_slice %129 {offsets = [0, 0], sizes = [8, 64], strides = [1, 1]} : vector<8x192xf32> to vector<8x64xf32>
    %133 = vector.extract_strided_slice %129 {offsets = [0, 64], sizes = [8, 64], strides = [1, 1]} : vector<8x192xf32> to vector<8x64xf32>
    %134 = vector.extract_strided_slice %129 {offsets = [0, 128], sizes = [8, 64], strides = [1, 1]} : vector<8x192xf32> to vector<8x64xf32>
    %135 = arith.mulf %133, %114 : vector<8x64xf32>
    %136 = arith.mulf %132, %131 : vector<8x64xf32>
    %137 = arith.addf %135, %136 : vector<8x64xf32>
    %138 = math.tanh %137 : vector<8x64xf32>
    %139 = arith.mulf %134, %138 : vector<8x64xf32>
    %140 = arith.select %119, %139, %113 : vector<8x64xi1>, vector<8x64xf32>
    %141 = arith.select %119, %137, %114 : vector<8x64xi1>, vector<8x64xf32>
    %c32_48 = arith.constant 32 : index
    %c0_49 = arith.constant 0 : index
    %142 = vector.load %arg6[%c32_48, %c0_49] : memref<64x64xf32, #tpu.memory_space<vmem>>, vector<8x64xf32>
    tpu.vector_store %arg6[%c32_48, %c0_49], %140 {strides = array<i32>} : memref<64x64xf32, #tpu.memory_space<vmem>>, vector<8x64xf32>,
    %c24_50 = arith.constant 24 : index
    %c0_51 = arith.constant 0 : index
    %143 = vector.load %arg7[%c24_50, %c0_51] : memref<64x64xf32, #tpu.memory_space<vmem>>, vector<8x64xf32>
    tpu.vector_store %arg7[%c24_50, %c0_51], %140 {strides = array<i32>} : memref<64x64xf32, #tpu.memory_space<vmem>>, vector<8x64xf32>,
    %c40_52 = arith.constant 40 : index
    %c0_53 = arith.constant 0 : index
    %144 = vector.load %arg1[%c40_52, %c0_53] : memref<64x64xf32, #tpu.memory_space<vmem>>, vector<8x64xf32>
    %cst_54 = arith.constant 5.000000e-01 : f32
    %145 = vector.broadcast %cst_54 : f32 to vector<8x64xf32>
    %146 = arith.cmpf ogt, %144, %145 : vector<8x64xf32>
    %147 = vector.extract_strided_slice %6 {offsets = [40, 0], sizes = [8, 256], strides = [1, 1]} : vector<64x256xf32> to vector<8x256xf32>
    %cst_55 = arith.constant dense<0.000000e+00> : vector<8x256xf32>
    %148 = tpu.matmul %140, %2, %cst_55 {dimension_numbers = #tpu.dot_dimension_numbers<[1], [0], [0], [1], [0, 0, 1, 1], [], []>} : vector<8x64xf32>, vector<64x256xf32>, vector<8x256xf32> -> vector<8x256xf32>
    %149 = arith.addf %147, %148 : vector<8x256xf32>
    %150 = vector.extract_strided_slice %149 {offsets = [0, 0], sizes = [8, 192], strides = [1, 1]} : vector<8x256xf32> to vector<8x192xf32>
    %cst_56 = arith.constant 0.000000e+00 : f32
    %151 = vector.broadcast %cst_56 : f32 to vector<8x192xf32>
    %152 = arith.subf %151, %150 : vector<8x192xf32>
    %153 = math.exp %152 : vector<8x192xf32>
    %cst_57 = arith.constant 1.000000e+00 : f32
    %154 = vector.broadcast %cst_57 : f32 to vector<8x192xf32>
    %155 = arith.addf %154, %153 : vector<8x192xf32>
    %156 = tpu.reciprocal %155 {approx = true} : vector<8x192xf32> -> vector<8x192xf32>
    %157 = vector.extract_strided_slice %149 {offsets = [0, 192], sizes = [8, 64], strides = [1, 1]} : vector<8x256xf32> to vector<8x64xf32>
    %158 = math.tanh %157 : vector<8x64xf32>
    %159 = vector.extract_strided_slice %156 {offsets = [0, 0], sizes = [8, 64], strides = [1, 1]} : vector<8x192xf32> to vector<8x64xf32>
    %160 = vector.extract_strided_slice %156 {offsets = [0, 64], sizes = [8, 64], strides = [1, 1]} : vector<8x192xf32> to vector<8x64xf32>
    %161 = vector.extract_strided_slice %156 {offsets = [0, 128], sizes = [8, 64], strides = [1, 1]} : vector<8x192xf32> to vector<8x64xf32>
    %162 = arith.mulf %160, %141 : vector<8x64xf32>
    %163 = arith.mulf %159, %158 : vector<8x64xf32>
    %164 = arith.addf %162, %163 : vector<8x64xf32>
    %165 = math.tanh %164 : vector<8x64xf32>
    %166 = arith.mulf %161, %165 : vector<8x64xf32>
    %167 = arith.select %146, %166, %140 : vector<8x64xi1>, vector<8x64xf32>
    %168 = arith.select %146, %164, %141 : vector<8x64xi1>, vector<8x64xf32>
    %c40_58 = arith.constant 40 : index
    %c0_59 = arith.constant 0 : index
    %169 = vector.load %arg6[%c40_58, %c0_59] : memref<64x64xf32, #tpu.memory_space<vmem>>, vector<8x64xf32>
    tpu.vector_store %arg6[%c40_58, %c0_59], %167 {strides = array<i32>} : memref<64x64xf32, #tpu.memory_space<vmem>>, vector<8x64xf32>,
    %c16_60 = arith.constant 16 : index
    %c0_61 = arith.constant 0 : index
    %170 = vector.load %arg7[%c16_60, %c0_61] : memref<64x64xf32, #tpu.memory_space<vmem>>, vector<8x64xf32>
    tpu.vector_store %arg7[%c16_60, %c0_61], %167 {strides = array<i32>} : memref<64x64xf32, #tpu.memory_space<vmem>>, vector<8x64xf32>,
    %c48_62 = arith.constant 48 : index
    %c0_63 = arith.constant 0 : index
    %171 = vector.load %arg1[%c48_62, %c0_63] : memref<64x64xf32, #tpu.memory_space<vmem>>, vector<8x64xf32>
    %cst_64 = arith.constant 5.000000e-01 : f32
    %172 = vector.broadcast %cst_64 : f32 to vector<8x64xf32>
    %173 = arith.cmpf ogt, %171, %172 : vector<8x64xf32>
    %174 = vector.extract_strided_slice %6 {offsets = [48, 0], sizes = [8, 256], strides = [1, 1]} : vector<64x256xf32> to vector<8x256xf32>
    %cst_65 = arith.constant dense<0.000000e+00> : vector<8x256xf32>
    %175 = tpu.matmul %167, %2, %cst_65 {dimension_numbers = #tpu.dot_dimension_numbers<[1], [0], [0], [1], [0, 0, 1, 1], [], []>} : vector<8x64xf32>, vector<64x256xf32>, vector<8x256xf32> -> vector<8x256xf32>
    %176 = arith.addf %174, %175 : vector<8x256xf32>
    %177 = vector.extract_strided_slice %176 {offsets = [0, 0], sizes = [8, 192], strides = [1, 1]} : vector<8x256xf32> to vector<8x192xf32>
    %cst_66 = arith.constant 0.000000e+00 : f32
    %178 = vector.broadcast %cst_66 : f32 to vector<8x192xf32>
    %179 = arith.subf %178, %177 : vector<8x192xf32>
    %180 = math.exp %179 : vector<8x192xf32>
    %cst_67 = arith.constant 1.000000e+00 : f32
    %181 = vector.broadcast %cst_67 : f32 to vector<8x192xf32>
    %182 = arith.addf %181, %180 : vector<8x192xf32>
    %183 = tpu.reciprocal %182 {approx = true} : vector<8x192xf32> -> vector<8x192xf32>
    %184 = vector.extract_strided_slice %176 {offsets = [0, 192], sizes = [8, 64], strides = [1, 1]} : vector<8x256xf32> to vector<8x64xf32>
    %185 = math.tanh %184 : vector<8x64xf32>
    %186 = vector.extract_strided_slice %183 {offsets = [0, 0], sizes = [8, 64], strides = [1, 1]} : vector<8x192xf32> to vector<8x64xf32>
    %187 = vector.extract_strided_slice %183 {offsets = [0, 64], sizes = [8, 64], strides = [1, 1]} : vector<8x192xf32> to vector<8x64xf32>
    %188 = vector.extract_strided_slice %183 {offsets = [0, 128], sizes = [8, 64], strides = [1, 1]} : vector<8x192xf32> to vector<8x64xf32>
    %189 = arith.mulf %187, %168 : vector<8x64xf32>
    %190 = arith.mulf %186, %185 : vector<8x64xf32>
    %191 = arith.addf %189, %190 : vector<8x64xf32>
    %192 = math.tanh %191 : vector<8x64xf32>
    %193 = arith.mulf %188, %192 : vector<8x64xf32>
    %194 = arith.select %173, %193, %167 : vector<8x64xi1>, vector<8x64xf32>
    %195 = arith.select %173, %191, %168 : vector<8x64xi1>, vector<8x64xf32>
    %c48_68 = arith.constant 48 : index
    %c0_69 = arith.constant 0 : index
    %196 = vector.load %arg6[%c48_68, %c0_69] : memref<64x64xf32, #tpu.memory_space<vmem>>, vector<8x64xf32>
    tpu.vector_store %arg6[%c48_68, %c0_69], %194 {strides = array<i32>} : memref<64x64xf32, #tpu.memory_space<vmem>>, vector<8x64xf32>,
    %c8_70 = arith.constant 8 : index
    %c0_71 = arith.constant 0 : index
    %197 = vector.load %arg7[%c8_70, %c0_71] : memref<64x64xf32, #tpu.memory_space<vmem>>, vector<8x64xf32>
    tpu.vector_store %arg7[%c8_70, %c0_71], %194 {strides = array<i32>} : memref<64x64xf32, #tpu.memory_space<vmem>>, vector<8x64xf32>,
    %c56_72 = arith.constant 56 : index
    %c0_73 = arith.constant 0 : index
    %198 = vector.load %arg1[%c56_72, %c0_73] : memref<64x64xf32, #tpu.memory_space<vmem>>, vector<8x64xf32>
    %cst_74 = arith.constant 5.000000e-01 : f32
    %199 = vector.broadcast %cst_74 : f32 to vector<8x64xf32>
    %200 = arith.cmpf ogt, %198, %199 : vector<8x64xf32>
    %201 = vector.extract_strided_slice %6 {offsets = [56, 0], sizes = [8, 256], strides = [1, 1]} : vector<64x256xf32> to vector<8x256xf32>
    %cst_75 = arith.constant dense<0.000000e+00> : vector<8x256xf32>
    %202 = tpu.matmul %194, %2, %cst_75 {dimension_numbers = #tpu.dot_dimension_numbers<[1], [0], [0], [1], [0, 0, 1, 1], [], []>} : vector<8x64xf32>, vector<64x256xf32>, vector<8x256xf32> -> vector<8x256xf32>
    %203 = arith.addf %201, %202 : vector<8x256xf32>
    %204 = vector.extract_strided_slice %203 {offsets = [0, 0], sizes = [8, 192], strides = [1, 1]} : vector<8x256xf32> to vector<8x192xf32>
    %cst_76 = arith.constant 0.000000e+00 : f32
    %205 = vector.broadcast %cst_76 : f32 to vector<8x192xf32>
    %206 = arith.subf %205, %204 : vector<8x192xf32>
    %207 = math.exp %206 : vector<8x192xf32>
    %cst_77 = arith.constant 1.000000e+00 : f32
    %208 = vector.broadcast %cst_77 : f32 to vector<8x192xf32>
    %209 = arith.addf %208, %207 : vector<8x192xf32>
    %210 = tpu.reciprocal %209 {approx = true} : vector<8x192xf32> -> vector<8x192xf32>
    %211 = vector.extract_strided_slice %203 {offsets = [0, 192], sizes = [8, 64], strides = [1, 1]} : vector<8x256xf32> to vector<8x64xf32>
    %212 = math.tanh %211 : vector<8x64xf32>
    %213 = vector.extract_strided_slice %210 {offsets = [0, 0], sizes = [8, 64], strides = [1, 1]} : vector<8x192xf32> to vector<8x64xf32>
    %214 = vector.extract_strided_slice %210 {offsets = [0, 64], sizes = [8, 64], strides = [1, 1]} : vector<8x192xf32> to vector<8x64xf32>
    %215 = vector.extract_strided_slice %210 {offsets = [0, 128], sizes = [8, 64], strides = [1, 1]} : vector<8x192xf32> to vector<8x64xf32>
    %216 = arith.mulf %214, %195 : vector<8x64xf32>
    %217 = arith.mulf %213, %212 : vector<8x64xf32>
    %218 = arith.addf %216, %217 : vector<8x64xf32>
    %219 = math.tanh %218 : vector<8x64xf32>
    %220 = arith.mulf %215, %219 : vector<8x64xf32>
    %221 = arith.select %200, %220, %194 : vector<8x64xi1>, vector<8x64xf32>
    %c56_78 = arith.constant 56 : index
    %c0_79 = arith.constant 0 : index
    %222 = vector.load %arg6[%c56_78, %c0_79] : memref<64x64xf32, #tpu.memory_space<vmem>>, vector<8x64xf32>
    tpu.vector_store %arg6[%c56_78, %c0_79], %221 {strides = array<i32>} : memref<64x64xf32, #tpu.memory_space<vmem>>, vector<8x64xf32>,
    %c0_80 = arith.constant 0 : index
    %c0_81 = arith.constant 0 : index
    %223 = vector.load %arg7[%c0_80, %c0_81] : memref<64x64xf32, #tpu.memory_space<vmem>>, vector<8x64xf32>
    tpu.vector_store %arg7[%c0_80, %c0_81], %221 {strides = array<i32>} : memref<64x64xf32, #tpu.memory_space<vmem>>, vector<8x64xf32>,
    %c0_82 = arith.constant 0 : index
    %c0_83 = arith.constant 0 : index
    %224 = vector.load %arg3[%c0_82, %c0_83] : memref<200x256xf32, #tpu.memory_space<vmem>>, vector<64x256xf32>
    %c64 = arith.constant 64 : index
    %c0_84 = arith.constant 0 : index
    %225 = vector.load %arg3[%c64, %c0_84] : memref<200x256xf32, #tpu.memory_space<vmem>>, vector<64x256xf32>
    %c128 = arith.constant 128 : index
    %c0_85 = arith.constant 0 : index
    %226 = vector.load %arg3[%c128, %c0_85] : memref<200x256xf32, #tpu.memory_space<vmem>>, vector<1x256xf32>
    %c136 = arith.constant 136 : index
    %c0_86 = arith.constant 0 : index
    %227 = vector.load %arg3[%c136, %c0_86] : memref<200x256xf32, #tpu.memory_space<vmem>>, vector<64x256xf32>
    %c0_87 = arith.constant 0 : index
    %c0_88 = arith.constant 0 : index
    %228 = vector.load %arg6[%c0_87, %c0_88] : memref<64x64xf32, #tpu.memory_space<vmem>>, vector<64x64xf32>
    %cst_89 = arith.constant dense<0.000000e+00> : vector<64x256xf32>
    %229 = tpu.matmul %228, %224, %cst_89 {dimension_numbers = #tpu.dot_dimension_numbers<[1], [0], [0], [1], [0, 0, 1, 1], [], []>} : vector<64x64xf32>, vector<64x256xf32>, vector<64x256xf32> -> vector<64x256xf32>
    %c0_90 = arith.constant 0 : index
    %c0_91 = arith.constant 0 : index
    %230 = vector.load %arg7[%c0_90, %c0_91] : memref<64x64xf32, #tpu.memory_space<vmem>>, vector<64x64xf32>
    %cst_92 = arith.constant dense<0.000000e+00> : vector<64x256xf32>
    %231 = tpu.matmul %230, %225, %cst_92 {dimension_numbers = #tpu.dot_dimension_numbers<[1], [0], [0], [1], [0, 0, 1, 1], [], []>} : vector<64x64xf32>, vector<64x256xf32>, vector<64x256xf32> -> vector<64x256xf32>
    %232 = arith.addf %229, %231 : vector<64x256xf32>
    %233 = vector.broadcast %226 : vector<1x256xf32> to vector<64x256xf32>
    %234 = arith.addf %232, %233 : vector<64x256xf32>
    %cst_93 = arith.constant 0.000000e+00 : f32
    %235 = vector.broadcast %cst_93 : f32 to vector<8x64xf32>
    %cst_94 = arith.constant 0.000000e+00 : f32
    %236 = vector.broadcast %cst_94 : f32 to vector<8x64xf32>
    %c0_95 = arith.constant 0 : index
    %c0_96 = arith.constant 0 : index
    %237 = vector.load %arg1[%c0_95, %c0_96] : memref<64x64xf32, #tpu.memory_space<vmem>>, vector<8x64xf32>
    %cst_97 = arith.constant 5.000000e-01 : f32
    %238 = vector.broadcast %cst_97 : f32 to vector<8x64xf32>
    %239 = arith.cmpf ogt, %237, %238 : vector<8x64xf32>
    %240 = vector.extract_strided_slice %234 {offsets = [0, 0], sizes = [8, 256], strides = [1, 1]} : vector<64x256xf32> to vector<8x256xf32>
    %cst_98 = arith.constant dense<0.000000e+00> : vector<8x256xf32>
    %241 = tpu.matmul %235, %227, %cst_98 {dimension_numbers = #tpu.dot_dimension_numbers<[1], [0], [0], [1], [0, 0, 1, 1], [], []>} : vector<8x64xf32>, vector<64x256xf32>, vector<8x256xf32> -> vector<8x256xf32>
    %242 = arith.addf %240, %241 : vector<8x256xf32>
    %243 = vector.extract_strided_slice %242 {offsets = [0, 0], sizes = [8, 192], strides = [1, 1]} : vector<8x256xf32> to vector<8x192xf32>
    %cst_99 = arith.constant 0.000000e+00 : f32
    %244 = vector.broadcast %cst_99 : f32 to vector<8x192xf32>
    %245 = arith.subf %244, %243 : vector<8x192xf32>
    %246 = math.exp %245 : vector<8x192xf32>
    %cst_100 = arith.constant 1.000000e+00 : f32
    %247 = vector.broadcast %cst_100 : f32 to vector<8x192xf32>
    %248 = arith.addf %247, %246 : vector<8x192xf32>
    %249 = tpu.reciprocal %248 {approx = true} : vector<8x192xf32> -> vector<8x192xf32>
    %250 = vector.extract_strided_slice %242 {offsets = [0, 192], sizes = [8, 64], strides = [1, 1]} : vector<8x256xf32> to vector<8x64xf32>
    %251 = math.tanh %250 : vector<8x64xf32>
    %252 = vector.extract_strided_slice %249 {offsets = [0, 0], sizes = [8, 64], strides = [1, 1]} : vector<8x192xf32> to vector<8x64xf32>
    %253 = vector.extract_strided_slice %249 {offsets = [0, 64], sizes = [8, 64], strides = [1, 1]} : vector<8x192xf32> to vector<8x64xf32>
    %254 = vector.extract_strided_slice %249 {offsets = [0, 128], sizes = [8, 64], strides = [1, 1]} : vector<8x192xf32> to vector<8x64xf32>
    %255 = arith.mulf %253, %236 : vector<8x64xf32>
    %256 = arith.mulf %252, %251 : vector<8x64xf32>
    %257 = arith.addf %255, %256 : vector<8x64xf32>
    %258 = math.tanh %257 : vector<8x64xf32>
    %259 = arith.mulf %254, %258 : vector<8x64xf32>
    %260 = arith.select %239, %259, %235 : vector<8x64xi1>, vector<8x64xf32>
    %261 = arith.select %239, %257, %236 : vector<8x64xi1>, vector<8x64xf32>
    %c8_101 = arith.constant 8 : index
    %c0_102 = arith.constant 0 : index
    %262 = vector.load %arg1[%c8_101, %c0_102] : memref<64x64xf32, #tpu.memory_space<vmem>>, vector<8x64xf32>
    %cst_103 = arith.constant 5.000000e-01 : f32
    %263 = vector.broadcast %cst_103 : f32 to vector<8x64xf32>
    %264 = arith.cmpf ogt, %262, %263 : vector<8x64xf32>
    %265 = vector.extract_strided_slice %234 {offsets = [8, 0], sizes = [8, 256], strides = [1, 1]} : vector<64x256xf32> to vector<8x256xf32>
    %cst_104 = arith.constant dense<0.000000e+00> : vector<8x256xf32>
    %266 = tpu.matmul %260, %227, %cst_104 {dimension_numbers = #tpu.dot_dimension_numbers<[1], [0], [0], [1], [0, 0, 1, 1], [], []>} : vector<8x64xf32>, vector<64x256xf32>, vector<8x256xf32> -> vector<8x256xf32>
    %267 = arith.addf %265, %266 : vector<8x256xf32>
    %268 = vector.extract_strided_slice %267 {offsets = [0, 0], sizes = [8, 192], strides = [1, 1]} : vector<8x256xf32> to vector<8x192xf32>
    %cst_105 = arith.constant 0.000000e+00 : f32
    %269 = vector.broadcast %cst_105 : f32 to vector<8x192xf32>
    %270 = arith.subf %269, %268 : vector<8x192xf32>
    %271 = math.exp %270 : vector<8x192xf32>
    %cst_106 = arith.constant 1.000000e+00 : f32
    %272 = vector.broadcast %cst_106 : f32 to vector<8x192xf32>
    %273 = arith.addf %272, %271 : vector<8x192xf32>
    %274 = tpu.reciprocal %273 {approx = true} : vector<8x192xf32> -> vector<8x192xf32>
    %275 = vector.extract_strided_slice %267 {offsets = [0, 192], sizes = [8, 64], strides = [1, 1]} : vector<8x256xf32> to vector<8x64xf32>
    %276 = math.tanh %275 : vector<8x64xf32>
    %277 = vector.extract_strided_slice %274 {offsets = [0, 0], sizes = [8, 64], strides = [1, 1]} : vector<8x192xf32> to vector<8x64xf32>
    %278 = vector.extract_strided_slice %274 {offsets = [0, 64], sizes = [8, 64], strides = [1, 1]} : vector<8x192xf32> to vector<8x64xf32>
    %279 = vector.extract_strided_slice %274 {offsets = [0, 128], sizes = [8, 64], strides = [1, 1]} : vector<8x192xf32> to vector<8x64xf32>
    %280 = arith.mulf %278, %261 : vector<8x64xf32>
    %281 = arith.mulf %277, %276 : vector<8x64xf32>
    %282 = arith.addf %280, %281 : vector<8x64xf32>
    %283 = math.tanh %282 : vector<8x64xf32>
    %284 = arith.mulf %279, %283 : vector<8x64xf32>
    %285 = arith.select %264, %284, %260 : vector<8x64xi1>, vector<8x64xf32>
    %286 = arith.select %264, %282, %261 : vector<8x64xi1>, vector<8x64xf32>
    %c16_107 = arith.constant 16 : index
    %c0_108 = arith.constant 0 : index
    %287 = vector.load %arg1[%c16_107, %c0_108] : memref<64x64xf32, #tpu.memory_space<vmem>>, vector<8x64xf32>
    %cst_109 = arith.constant 5.000000e-01 : f32
    %288 = vector.broadcast %cst_109 : f32 to vector<8x64xf32>
    %289 = arith.cmpf ogt, %287, %288 : vector<8x64xf32>
    %290 = vector.extract_strided_slice %234 {offsets = [16, 0], sizes = [8, 256], strides = [1, 1]} : vector<64x256xf32> to vector<8x256xf32>
    %cst_110 = arith.constant dense<0.000000e+00> : vector<8x256xf32>
    %291 = tpu.matmul %285, %227, %cst_110 {dimension_numbers = #tpu.dot_dimension_numbers<[1], [0], [0], [1], [0, 0, 1, 1], [], []>} : vector<8x64xf32>, vector<64x256xf32>, vector<8x256xf32> -> vector<8x256xf32>
    %292 = arith.addf %290, %291 : vector<8x256xf32>
    %293 = vector.extract_strided_slice %292 {offsets = [0, 0], sizes = [8, 192], strides = [1, 1]} : vector<8x256xf32> to vector<8x192xf32>
    %cst_111 = arith.constant 0.000000e+00 : f32
    %294 = vector.broadcast %cst_111 : f32 to vector<8x192xf32>
    %295 = arith.subf %294, %293 : vector<8x192xf32>
    %296 = math.exp %295 : vector<8x192xf32>
    %cst_112 = arith.constant 1.000000e+00 : f32
    %297 = vector.broadcast %cst_112 : f32 to vector<8x192xf32>
    %298 = arith.addf %297, %296 : vector<8x192xf32>
    %299 = tpu.reciprocal %298 {approx = true} : vector<8x192xf32> -> vector<8x192xf32>
    %300 = vector.extract_strided_slice %292 {offsets = [0, 192], sizes = [8, 64], strides = [1, 1]} : vector<8x256xf32> to vector<8x64xf32>
    %301 = math.tanh %300 : vector<8x64xf32>
    %302 = vector.extract_strided_slice %299 {offsets = [0, 0], sizes = [8, 64], strides = [1, 1]} : vector<8x192xf32> to vector<8x64xf32>
    %303 = vector.extract_strided_slice %299 {offsets = [0, 64], sizes = [8, 64], strides = [1, 1]} : vector<8x192xf32> to vector<8x64xf32>
    %304 = vector.extract_strided_slice %299 {offsets = [0, 128], sizes = [8, 64], strides = [1, 1]} : vector<8x192xf32> to vector<8x64xf32>
    %305 = arith.mulf %303, %286 : vector<8x64xf32>
    %306 = arith.mulf %302, %301 : vector<8x64xf32>
    %307 = arith.addf %305, %306 : vector<8x64xf32>
    %308 = math.tanh %307 : vector<8x64xf32>
    %309 = arith.mulf %304, %308 : vector<8x64xf32>
    %310 = arith.select %289, %309, %285 : vector<8x64xi1>, vector<8x64xf32>
    %311 = arith.select %289, %307, %286 : vector<8x64xi1>, vector<8x64xf32>
    %c24_113 = arith.constant 24 : index
    %c0_114 = arith.constant 0 : index
    %312 = vector.load %arg1[%c24_113, %c0_114] : memref<64x64xf32, #tpu.memory_space<vmem>>, vector<8x64xf32>
    %cst_115 = arith.constant 5.000000e-01 : f32
    %313 = vector.broadcast %cst_115 : f32 to vector<8x64xf32>
    %314 = arith.cmpf ogt, %312, %313 : vector<8x64xf32>
    %315 = vector.extract_strided_slice %234 {offsets = [24, 0], sizes = [8, 256], strides = [1, 1]} : vector<64x256xf32> to vector<8x256xf32>
    %cst_116 = arith.constant dense<0.000000e+00> : vector<8x256xf32>
    %316 = tpu.matmul %310, %227, %cst_116 {dimension_numbers = #tpu.dot_dimension_numbers<[1], [0], [0], [1], [0, 0, 1, 1], [], []>} : vector<8x64xf32>, vector<64x256xf32>, vector<8x256xf32> -> vector<8x256xf32>
    %317 = arith.addf %315, %316 : vector<8x256xf32>
    %318 = vector.extract_strided_slice %317 {offsets = [0, 0], sizes = [8, 192], strides = [1, 1]} : vector<8x256xf32> to vector<8x192xf32>
    %cst_117 = arith.constant 0.000000e+00 : f32
    %319 = vector.broadcast %cst_117 : f32 to vector<8x192xf32>
    %320 = arith.subf %319, %318 : vector<8x192xf32>
    %321 = math.exp %320 : vector<8x192xf32>
    %cst_118 = arith.constant 1.000000e+00 : f32
    %322 = vector.broadcast %cst_118 : f32 to vector<8x192xf32>
    %323 = arith.addf %322, %321 : vector<8x192xf32>
    %324 = tpu.reciprocal %323 {approx = true} : vector<8x192xf32> -> vector<8x192xf32>
    %325 = vector.extract_strided_slice %317 {offsets = [0, 192], sizes = [8, 64], strides = [1, 1]} : vector<8x256xf32> to vector<8x64xf32>
    %326 = math.tanh %325 : vector<8x64xf32>
    %327 = vector.extract_strided_slice %324 {offsets = [0, 0], sizes = [8, 64], strides = [1, 1]} : vector<8x192xf32> to vector<8x64xf32>
    %328 = vector.extract_strided_slice %324 {offsets = [0, 64], sizes = [8, 64], strides = [1, 1]} : vector<8x192xf32> to vector<8x64xf32>
    %329 = vector.extract_strided_slice %324 {offsets = [0, 128], sizes = [8, 64], strides = [1, 1]} : vector<8x192xf32> to vector<8x64xf32>
    %330 = arith.mulf %328, %311 : vector<8x64xf32>
    %331 = arith.mulf %327, %326 : vector<8x64xf32>
    %332 = arith.addf %330, %331 : vector<8x64xf32>
    %333 = math.tanh %332 : vector<8x64xf32>
    %334 = arith.mulf %329, %333 : vector<8x64xf32>
    %335 = arith.select %314, %334, %310 : vector<8x64xi1>, vector<8x64xf32>
    %336 = arith.select %314, %332, %311 : vector<8x64xi1>, vector<8x64xf32>
    %c32_119 = arith.constant 32 : index
    %c0_120 = arith.constant 0 : index
    %337 = vector.load %arg1[%c32_119, %c0_120] : memref<64x64xf32, #tpu.memory_space<vmem>>, vector<8x64xf32>
    %cst_121 = arith.constant 5.000000e-01 : f32
    %338 = vector.broadcast %cst_121 : f32 to vector<8x64xf32>
    %339 = arith.cmpf ogt, %337, %338 : vector<8x64xf32>
    %340 = vector.extract_strided_slice %234 {offsets = [32, 0], sizes = [8, 256], strides = [1, 1]} : vector<64x256xf32> to vector<8x256xf32>
    %cst_122 = arith.constant dense<0.000000e+00> : vector<8x256xf32>
    %341 = tpu.matmul %335, %227, %cst_122 {dimension_numbers = #tpu.dot_dimension_numbers<[1], [0], [0], [1], [0, 0, 1, 1], [], []>} : vector<8x64xf32>, vector<64x256xf32>, vector<8x256xf32> -> vector<8x256xf32>
    %342 = arith.addf %340, %341 : vector<8x256xf32>
    %343 = vector.extract_strided_slice %342 {offsets = [0, 0], sizes = [8, 192], strides = [1, 1]} : vector<8x256xf32> to vector<8x192xf32>
    %cst_123 = arith.constant 0.000000e+00 : f32
    %344 = vector.broadcast %cst_123 : f32 to vector<8x192xf32>
    %345 = arith.subf %344, %343 : vector<8x192xf32>
    %346 = math.exp %345 : vector<8x192xf32>
    %cst_124 = arith.constant 1.000000e+00 : f32
    %347 = vector.broadcast %cst_124 : f32 to vector<8x192xf32>
    %348 = arith.addf %347, %346 : vector<8x192xf32>
    %349 = tpu.reciprocal %348 {approx = true} : vector<8x192xf32> -> vector<8x192xf32>
    %350 = vector.extract_strided_slice %342 {offsets = [0, 192], sizes = [8, 64], strides = [1, 1]} : vector<8x256xf32> to vector<8x64xf32>
    %351 = math.tanh %350 : vector<8x64xf32>
    %352 = vector.extract_strided_slice %349 {offsets = [0, 0], sizes = [8, 64], strides = [1, 1]} : vector<8x192xf32> to vector<8x64xf32>
    %353 = vector.extract_strided_slice %349 {offsets = [0, 64], sizes = [8, 64], strides = [1, 1]} : vector<8x192xf32> to vector<8x64xf32>
    %354 = vector.extract_strided_slice %349 {offsets = [0, 128], sizes = [8, 64], strides = [1, 1]} : vector<8x192xf32> to vector<8x64xf32>
    %355 = arith.mulf %353, %336 : vector<8x64xf32>
    %356 = arith.mulf %352, %351 : vector<8x64xf32>
    %357 = arith.addf %355, %356 : vector<8x64xf32>
    %358 = math.tanh %357 : vector<8x64xf32>
    %359 = arith.mulf %354, %358 : vector<8x64xf32>
    %360 = arith.select %339, %359, %335 : vector<8x64xi1>, vector<8x64xf32>
    %361 = arith.select %339, %357, %336 : vector<8x64xi1>, vector<8x64xf32>
    %c40_125 = arith.constant 40 : index
    %c0_126 = arith.constant 0 : index
    %362 = vector.load %arg1[%c40_125, %c0_126] : memref<64x64xf32, #tpu.memory_space<vmem>>, vector<8x64xf32>
    %cst_127 = arith.constant 5.000000e-01 : f32
    %363 = vector.broadcast %cst_127 : f32 to vector<8x64xf32>
    %364 = arith.cmpf ogt, %362, %363 : vector<8x64xf32>
    %365 = vector.extract_strided_slice %234 {offsets = [40, 0], sizes = [8, 256], strides = [1, 1]} : vector<64x256xf32> to vector<8x256xf32>
    %cst_128 = arith.constant dense<0.000000e+00> : vector<8x256xf32>
    %366 = tpu.matmul %360, %227, %cst_128 {dimension_numbers = #tpu.dot_dimension_numbers<[1], [0], [0], [1], [0, 0, 1, 1], [], []>} : vector<8x64xf32>, vector<64x256xf32>, vector<8x256xf32> -> vector<8x256xf32>
    %367 = arith.addf %365, %366 : vector<8x256xf32>
    %368 = vector.extract_strided_slice %367 {offsets = [0, 0], sizes = [8, 192], strides = [1, 1]} : vector<8x256xf32> to vector<8x192xf32>
    %cst_129 = arith.constant 0.000000e+00 : f32
    %369 = vector.broadcast %cst_129 : f32 to vector<8x192xf32>
    %370 = arith.subf %369, %368 : vector<8x192xf32>
    %371 = math.exp %370 : vector<8x192xf32>
    %cst_130 = arith.constant 1.000000e+00 : f32
    %372 = vector.broadcast %cst_130 : f32 to vector<8x192xf32>
    %373 = arith.addf %372, %371 : vector<8x192xf32>
    %374 = tpu.reciprocal %373 {approx = true} : vector<8x192xf32> -> vector<8x192xf32>
    %375 = vector.extract_strided_slice %367 {offsets = [0, 192], sizes = [8, 64], strides = [1, 1]} : vector<8x256xf32> to vector<8x64xf32>
    %376 = math.tanh %375 : vector<8x64xf32>
    %377 = vector.extract_strided_slice %374 {offsets = [0, 0], sizes = [8, 64], strides = [1, 1]} : vector<8x192xf32> to vector<8x64xf32>
    %378 = vector.extract_strided_slice %374 {offsets = [0, 64], sizes = [8, 64], strides = [1, 1]} : vector<8x192xf32> to vector<8x64xf32>
    %379 = vector.extract_strided_slice %374 {offsets = [0, 128], sizes = [8, 64], strides = [1, 1]} : vector<8x192xf32> to vector<8x64xf32>
    %380 = arith.mulf %378, %361 : vector<8x64xf32>
    %381 = arith.mulf %377, %376 : vector<8x64xf32>
    %382 = arith.addf %380, %381 : vector<8x64xf32>
    %383 = math.tanh %382 : vector<8x64xf32>
    %384 = arith.mulf %379, %383 : vector<8x64xf32>
    %385 = arith.select %364, %384, %360 : vector<8x64xi1>, vector<8x64xf32>
    %386 = arith.select %364, %382, %361 : vector<8x64xi1>, vector<8x64xf32>
    %c48_131 = arith.constant 48 : index
    %c0_132 = arith.constant 0 : index
    %387 = vector.load %arg1[%c48_131, %c0_132] : memref<64x64xf32, #tpu.memory_space<vmem>>, vector<8x64xf32>
    %cst_133 = arith.constant 5.000000e-01 : f32
    %388 = vector.broadcast %cst_133 : f32 to vector<8x64xf32>
    %389 = arith.cmpf ogt, %387, %388 : vector<8x64xf32>
    %390 = vector.extract_strided_slice %234 {offsets = [48, 0], sizes = [8, 256], strides = [1, 1]} : vector<64x256xf32> to vector<8x256xf32>
    %cst_134 = arith.constant dense<0.000000e+00> : vector<8x256xf32>
    %391 = tpu.matmul %385, %227, %cst_134 {dimension_numbers = #tpu.dot_dimension_numbers<[1], [0], [0], [1], [0, 0, 1, 1], [], []>} : vector<8x64xf32>, vector<64x256xf32>, vector<8x256xf32> -> vector<8x256xf32>
    %392 = arith.addf %390, %391 : vector<8x256xf32>
    %393 = vector.extract_strided_slice %392 {offsets = [0, 0], sizes = [8, 192], strides = [1, 1]} : vector<8x256xf32> to vector<8x192xf32>
    %cst_135 = arith.constant 0.000000e+00 : f32
    %394 = vector.broadcast %cst_135 : f32 to vector<8x192xf32>
    %395 = arith.subf %394, %393 : vector<8x192xf32>
    %396 = math.exp %395 : vector<8x192xf32>
    %cst_136 = arith.constant 1.000000e+00 : f32
    %397 = vector.broadcast %cst_136 : f32 to vector<8x192xf32>
    %398 = arith.addf %397, %396 : vector<8x192xf32>
    %399 = tpu.reciprocal %398 {approx = true} : vector<8x192xf32> -> vector<8x192xf32>
    %400 = vector.extract_strided_slice %392 {offsets = [0, 192], sizes = [8, 64], strides = [1, 1]} : vector<8x256xf32> to vector<8x64xf32>
    %401 = math.tanh %400 : vector<8x64xf32>
    %402 = vector.extract_strided_slice %399 {offsets = [0, 0], sizes = [8, 64], strides = [1, 1]} : vector<8x192xf32> to vector<8x64xf32>
    %403 = vector.extract_strided_slice %399 {offsets = [0, 64], sizes = [8, 64], strides = [1, 1]} : vector<8x192xf32> to vector<8x64xf32>
    %404 = vector.extract_strided_slice %399 {offsets = [0, 128], sizes = [8, 64], strides = [1, 1]} : vector<8x192xf32> to vector<8x64xf32>
    %405 = arith.mulf %403, %386 : vector<8x64xf32>
    %406 = arith.mulf %402, %401 : vector<8x64xf32>
    %407 = arith.addf %405, %406 : vector<8x64xf32>
    %408 = math.tanh %407 : vector<8x64xf32>
    %409 = arith.mulf %404, %408 : vector<8x64xf32>
    %410 = arith.select %389, %409, %385 : vector<8x64xi1>, vector<8x64xf32>
    %411 = arith.select %389, %407, %386 : vector<8x64xi1>, vector<8x64xf32>
    %c56_137 = arith.constant 56 : index
    %c0_138 = arith.constant 0 : index
    %412 = vector.load %arg1[%c56_137, %c0_138] : memref<64x64xf32, #tpu.memory_space<vmem>>, vector<8x64xf32>
    %cst_139 = arith.constant 5.000000e-01 : f32
    %413 = vector.broadcast %cst_139 : f32 to vector<8x64xf32>
    %414 = arith.cmpf ogt, %412, %413 : vector<8x64xf32>
    %415 = vector.extract_strided_slice %234 {offsets = [56, 0], sizes = [8, 256], strides = [1, 1]} : vector<64x256xf32> to vector<8x256xf32>
    %cst_140 = arith.constant dense<0.000000e+00> : vector<8x256xf32>
    %416 = tpu.matmul %410, %227, %cst_140 {dimension_numbers = #tpu.dot_dimension_numbers<[1], [0], [0], [1], [0, 0, 1, 1], [], []>} : vector<8x64xf32>, vector<64x256xf32>, vector<8x256xf32> -> vector<8x256xf32>
    %417 = arith.addf %415, %416 : vector<8x256xf32>
    %418 = vector.extract_strided_slice %417 {offsets = [0, 0], sizes = [8, 192], strides = [1, 1]} : vector<8x256xf32> to vector<8x192xf32>
    %cst_141 = arith.constant 0.000000e+00 : f32
    %419 = vector.broadcast %cst_141 : f32 to vector<8x192xf32>
    %420 = arith.subf %419, %418 : vector<8x192xf32>
    %421 = math.exp %420 : vector<8x192xf32>
    %cst_142 = arith.constant 1.000000e+00 : f32
    %422 = vector.broadcast %cst_142 : f32 to vector<8x192xf32>
    %423 = arith.addf %422, %421 : vector<8x192xf32>
    %424 = tpu.reciprocal %423 {approx = true} : vector<8x192xf32> -> vector<8x192xf32>
    %425 = vector.extract_strided_slice %417 {offsets = [0, 192], sizes = [8, 64], strides = [1, 1]} : vector<8x256xf32> to vector<8x64xf32>
    %426 = math.tanh %425 : vector<8x64xf32>
    %427 = vector.extract_strided_slice %424 {offsets = [0, 0], sizes = [8, 64], strides = [1, 1]} : vector<8x192xf32> to vector<8x64xf32>
    %428 = vector.extract_strided_slice %424 {offsets = [0, 64], sizes = [8, 64], strides = [1, 1]} : vector<8x192xf32> to vector<8x64xf32>
    %429 = vector.extract_strided_slice %424 {offsets = [0, 128], sizes = [8, 64], strides = [1, 1]} : vector<8x192xf32> to vector<8x64xf32>
    %430 = arith.mulf %428, %411 : vector<8x64xf32>
    %431 = arith.mulf %427, %426 : vector<8x64xf32>
    %432 = arith.addf %430, %431 : vector<8x64xf32>
    %433 = math.tanh %432 : vector<8x64xf32>
    %434 = arith.mulf %429, %433 : vector<8x64xf32>
    %435 = arith.select %414, %434, %410 : vector<8x64xi1>, vector<8x64xf32>
    %c0_143 = arith.constant 0 : index
    %c0_144 = arith.constant 0 : index
    %436 = vector.load %arg4[%c0_143, %c0_144] : memref<72x1xf32, #tpu.memory_space<vmem>>, vector<64x1xf32>
    %c64_145 = arith.constant 64 : index
    %c0_146 = arith.constant 0 : index
    %437 = vector.load %arg4[%c64_145, %c0_146] : memref<72x1xf32, #tpu.memory_space<vmem>>, vector<1x1xf32>
    %cst_147 = arith.constant dense<0.000000e+00> : vector<8x1xf32>
    %438 = tpu.matmul %435, %436, %cst_147 {dimension_numbers = #tpu.dot_dimension_numbers<[1], [0], [0], [1], [0, 0, 1, 1], [], []>} : vector<8x64xf32>, vector<64x1xf32>, vector<8x1xf32> -> vector<8x1xf32>
    %439 = vector.broadcast %437 : vector<1x1xf32> to vector<8x1xf32>
    %440 = arith.addf %438, %439 : vector<8x1xf32>
    %441 = arith.negf %440 : vector<8x1xf32>
    %442 = math.exp %441 : vector<8x1xf32>
    %cst_148 = arith.constant 1.000000e+00 : f32
    %443 = vector.broadcast %cst_148 : f32 to vector<8x1xf32>
    %444 = arith.addf %443, %442 : vector<8x1xf32>
    %445 = arith.divf %443, %444 : vector<8x1xf32>
    %c0_149 = arith.constant 0 : index
    %c0_150 = arith.constant 0 : index
    %446 = vector.load %arg5[%c0_149, %c0_150] : memref<8x1xf32, #tpu.memory_space<vmem>>, vector<8x1xf32>
    tpu.vector_store %arg5[%c0_149, %c0_150], %445 {strides = array<i32>} : memref<8x1xf32, #tpu.memory_space<vmem>>, vector<8x1xf32>,
    return
  }
}

</mosaic_0001>

<bundles_post_ra>
// kernel: classifier_forward.1
= control target key start
LH: loop header
LB: loop body
LE: loop exit
PB: predicated region body
PF: predicated region fallthrough
CT: control target
= control target key end

     0   :  { %v2790_v3 = vmov 0.0   ;;  %vm65_vm0 = vcmask 261120   ;;  %v55_v26 = vlaneseq  ;;  %vm205_vm2 = vcmask 523264   ;;  %s3797_s2 = inlined_call_operand.vmem [shape: f32[104,256], index: 2, kind: input, shape index: {}]   ;;  %s3798_s0 = inlined_call_operand.vmem [shape: f32[64,32], index: 0, kind: input, shape index: {}]   ;;  %s3799_s1 = inlined_call_operand.vmem [shape: f32[64,64], index: 1, kind: input, shape index: {}]   ;;  %s3800_s3 = inlined_call_operand.vmem [shape: f32[200,256], index: 3, kind: input, shape index: {}]   ;;  %s3801_s4 = inlined_call_operand.vmem [shape: f32[72,1], index: 4, kind: input, shape index: {}]   ;;  %s3802_s5 = inlined_call_operand.vmem [shape: f32[8,1], index: 5, kind: output, shape index: {}]  }
   0x1   :  { %v2826_v0 = vld [vmem:[%s3797_s2 + $0xc8] sm:$0xff]  ;;  %v2831_v1 = vld [vmem:[%s3797_s2 + $0xc0] sm:$0xff]  ;;  %v2836_v2 = vld [vmem:[%s3797_s2 + $0xb8] sm:$0xff]  ;;  %154 = vmatprep.mubr.f32.mxu0 %v2790_v3  ;;  %273 = vmatprep.mubr.f32.mxu1 %v2790_v3 }
   0x2   :  { %225 = vmatprep.subr.mxu1 %v2826_v0  ;;  %v2844_v4 = vld [vmem:[%s3797_s2 + $0xb0] sm:$0xff]  ;;  %v27_v5 = vld [vmem:[%s3797_s2 + $0x38] sm:$0xff]  ;;  %v2853_v6 = vld [vmem:[%s3797_s2 + $0xa8] sm:$0xff]  ;;  %v2986_v27 = vshrl.u32 %v55_v26, 7 }
   0x3   :  { %226 = vmatpush1.msra.mxu1 %v2831_v1  ;;  %114 = vmatprep.subr.mxu0 %v27_v5  ;;  %v26_v7 = vld [vmem:[%s3797_s2 + $0x30] sm:$0xff]  ;;  %v25_v8 = vld [vmem:[%s3797_s2 + $0x28] sm:$0xff]  ;;  %v2865_v9 = vld [vmem:[%s3797_s2 + $0xa0] sm:$0xff] }
   0x4   :  { %227 = vmatprep.subr.mxu1 %v2836_v2  ;;  %115 = vmatpush1.msra.mxu0 %v26_v7  ;;  %v24_v10 = vld [vmem:[%s3797_s2 + $0x20] sm:$0xff]  ;;  %v2874_v11 = vld [vmem:[%s3797_s2 + $0x98] sm:$0xff]  ;;  %v22_v13 = vld [vmem:[%s3797_s2 + $0x10] sm:$0xff]  ;;  %v57_v28 = vsub.s32 0, %v2986_v27  ;;  %v61_v31 = vsub.s32 1, %v2986_v27 }
   0x5   :  { %228 = vmatpush1.msra.mxu1 %v2844_v4  ;;  %116 = vmatprep.subr.mxu0 %v25_v8  ;;  %v23_v12 = vld [vmem:[%s3797_s2 + $0x18] sm:$0xff]  ;;  %v2886_v14 = vld [vmem:[%s3797_s2 + $0x90] sm:$0xff]  ;;  %v21_v15 = vld [vmem:[%s3797_s2 + $0x8] sm:$0xff] }
   0x6   :  { %229 = vmatprep.subr.mxu1 %v2853_v6  ;;  %117 = vmatpush1.msra.mxu0 %v24_v10  ;;  %v2895_v16 = vld [vmem:[%s3797_s2 + $0x88] sm:$0xff]  ;;  %v20_v17 = vld [vmem:[%s3797_s2] sm:$0xff]  ;;  %v2913_v20 = vld [vmem:[%s3797_s2 + $0x78] sm:$0xff] }
   0x7   :  { %230 = vmatpush1.msra.mxu1 %v2865_v9  ;;  %118 = vmatprep.subr.mxu0 %v23_v12  ;;  %v2904_v18 = vld [vmem:[%s3797_s2 + $0x80] sm:$0xff]  ;;  %v2919_v21 = vld [vmem:[%s3797_s2 + $0x70] sm:$0xff]  ;;  %v2926_v22 = vld [vmem:[%s3797_s2 + $0x68] sm:$0xff] }
   0x8   :  { %231 = vmatprep.subr.mxu1 %v2874_v11  ;;  %119 = vmatpush1.msra.mxu0 %v22_v13  ;;  %v46_v19 = vld [vmem:[%s3798_s0] sm:$0xff]  ;;  %v2939_v24 = vld [vmem:[%s3797_s2 + $0x58] sm:$0xff]  ;;  %v2946_v25 = vld [vmem:[%s3797_s2 + $0x50] sm:$0xff] }
   0x9   :  { %232 = vmatpush1.msra.mxu1 %v2886_v14  ;;  %120 = vmatprep.subr.mxu0 %v21_v15  ;;  %v2932_v23 = vld [vmem:[%s3797_s2 + $0x60] sm:$0xff]  ;;  %v47_v49 = vld [vmem:[%s3798_s0 + $0x8] sm:$0xff] }
   0xa   :  { %233 = vmatprep.subr.mxu1 %v2895_v16  ;;  %121 = vmatpush1.msra.mxu0 %v20_v17  ;;  %v2520_v29 = vld [vmem:[%s3797_s2 + $0x40] ss:$8 sm:$0x3]  ;;  %s2791_s2 = smov 64  }
   0xb   :  { %234 = vmatpush1.msra.mxu1 %v2904_v18  ;;  %2521 = vmatmul.mubr.msk.f32.vlgmr.msra.gmra.mxu0 %vm65_vm0, %v46_v19  ;;  %v2994_v30 = vrot.slane %v2520_v29, %v57_v28  ;;  %v3000_v34 = vrot.slane %v2520_v29, %v61_v31  ;;  %v203_v58 = vld [vmem:[%s3799_s1] sm:$0xff] }
   0xc   :  { %235 = vmatprep.subr.mxu1 %v2913_v20  ;;  %160 = vmatprep.mubr.f32.mxu0 %v2790_v3  ;;  %vm204_vm1 = vcmp.gt.f32.partialorder %v203_v58, 0.5 }
   0xd   :  { %236 = vmatpush1.msra.mxu1 %v2919_v21  ;;  %457 = vmatprep.subr.mxu0 %v2826_v0 }
   0xe   :  { %237 = vmatprep.subr.mxu1 %v2926_v22  ;;  %458 = vmatpush1.msra.mxu0 %v2831_v1 }
   0xf   :  { %238 = vmatpush1.msra.mxu1 %v2932_v23  ;;  %459 = vmatprep.subr.mxu0 %v2836_v2 }
  0x10   :  { %239 = vmatprep.subr.mxu1 %v2939_v24  ;;  %460 = vmatpush1.msra.mxu0 %v2844_v4 }
  0x11   :  { %240 = vmatpush1.msra.mxu1 %v2946_v25  ;;  %461 = vmatprep.subr.mxu0 %v2853_v6 }
  0x12   :  { %274 = vmatmul.mubr.f32.vlgmr.msra.gmra.mxu1 %v2790_v3  ;;  %339 = vmatprep.subr.mxu1 %v2826_v0 }
  0x13   :  { %340 = vmatpush1.msra.mxu1 %v2831_v1  ;;  %387 = vmatprep.mubr.f32.mxu1 %v2790_v3 }
  0x14   :  { %341 = vmatprep.subr.mxu1 %v2836_v2  ;;  %462 = vmatpush1.msra.mxu0 %v2865_v9 }
  0x15   :  { %342 = vmatpush1.msra.mxu1 %v2844_v4  ;;  %463 = vmatprep.subr.mxu0 %v2874_v11 }
  0x16   :  { %343 = vmatprep.subr.mxu1 %v2853_v6  ;;  %464 = vmatpush1.msra.mxu0 %v2886_v14 }
  0x17   :  { %344 = vmatpush1.msra.mxu1 %v2865_v9  ;;  %465 = vmatprep.subr.mxu0 %v2895_v16 }
  0x18   :  { %345 = vmatprep.subr.mxu1 %v2874_v11  ;;  %466 = vmatpush1.msra.mxu0 %v2904_v18 }
  0x19   :  { %346 = vmatpush1.msra.mxu1 %v2886_v14  ;;  %467 = vmatprep.subr.mxu0 %v2913_v20 }
  0x1a   :  { %347 = vmatprep.subr.mxu1 %v2895_v16  ;;  %468 = vmatpush1.msra.mxu0 %v2919_v21 }
  0x1b   :  { %348 = vmatpush1.msra.mxu1 %v2904_v18  ;;  %469 = vmatprep.subr.mxu0 %v2926_v22 }
  0x1c   :  { %349 = vmatprep.subr.mxu1 %v2913_v20  ;;  %470 = vmatpush1.msra.mxu0 %v2932_v23 }
  0x1d   :  { %350 = vmatpush1.msra.mxu1 %v2919_v21  ;;  %471 = vmatprep.subr.mxu0 %v2939_v24 }
  0x1e   :  { %351 = vmatprep.subr.mxu1 %v2926_v22  ;;  %472 = vmatpush1.msra.mxu0 %v2946_v25 }
  0x1f   :  { %352 = vmatpush1.msra.mxu1 %v2932_v23  ;;  %693 = vmatprep.subr.mxu0 %v2826_v0 }
  0x20   :  { %353 = vmatprep.subr.mxu1 %v2939_v24  ;;  %2522 = vmatmul.mubr.msk.f32.gmra.mxu0 %vm65_vm0, %v47_v49 }
  0x21   :  { %354 = vmatpush1.msra.mxu1 %v2946_v25  ;;  %166 = vmatprep.mubr.f32.mxu0 %v2790_v3 }
  0x22   :  { %575 = vmatprep.subr.mxu1 %v2826_v0 }
  0xcb   :  { %v156_v32 = vpop.f32.mrf.mxu0 }
  0xcc   :  { %v157_v33 = vadd.f32 %v156_v32, %v2994_v30 }
  0xcd   :  { %v158_v35 = vpop.f32.mrf.mxu0 }
  0xce   :  { %v159_v37 = vadd.f32 %v158_v35, %v3000_v34 }
  0xd2   :  { %v275_v36 = vpop.f32.mrf.mxu1 }
  0xd3   :  { %v280_v38 = vadd.f32 %v275_v36, %v157_v33 }
  0xd4   :  { %v277_v39 = vpop.f32.mrf.mxu1 }
  0xd5   :  { %v281_v40 = vadd.f32 %v277_v39, %v159_v37  ;;  %v282_v42 = vsub.f32 0.0, %v280_v38  ;;  %v48_v39 = vld [vmem:[%s3798_s0 + $0x10] sm:$0xff] }
  0xd6   :  { %2523 = vmatmul.mubr.msk.f32.gmra.mxu0 %vm65_vm0, %v48_v39 }
  0xd7   :  { %2594 = vtanh.f32 %v281_v40  ;;  %v284_v43 = vmul.f32 1.442695, %v282_v42  ;;  %v283_v54 = vsub.f32 0.0, %v281_v40  ;;  %172 = vmatprep.mubr.f32.mxu0 %v2790_v3  ;;  %v49_v40 = vld [vmem:[%s3798_s0 + $0x18] sm:$0xff]  ;;  %v51_v42 = vld [vmem:[%s3798_s0 + $0x28] sm:$0xff] }
  0xd9   :  { %2596 = vpow2.f32 %v284_v43  ;;  %v286_v55 = vmul.f32 1.442695, %v283_v54  ;;  %v52_v43 = vld [vmem:[%s3798_s0 + $0x30] sm:$0xff] }
  0xda   :  { %2524 = vmatmul.mubr.msk.f32.gmra.mxu0 %vm65_vm0, %v49_v40 }
  0xdb   :  { %178 = vmatprep.mubr.f32.mxu0 %v2790_v3 }
  0xe0   :  { %v162_v7 = vpop.f32.mrf.mxu0 }
  0xe1   :  { %v163_v8 = vadd.f32 %v162_v7, %v2994_v30 }
  0xe2   :  { %v164_v10 = vpop.f32.mrf.mxu0 }
  0xe3   :  { %v165_v13 = vadd.f32 %v164_v10, %v3000_v34 }
  0xe4   :  { %v2595_v41 = vpop.eup %2594 }
  0xe5   :  { %295 = vrot.lane.b32.xlu0 %v2595_v41, %s2791_s2  ;;  %v50_v41 = vld [vmem:[%s3798_s0 + $0x20] sm:$0xff] }
  0xe6   :  { %v2597_v44 = vpop.eup %2596  ;;  %2525 = vmatmul.mubr.msk.f32.gmra.mxu0 %vm65_vm0, %v50_v41 }
  0xe7   :  { %v288_v45 = vadd.f32 1.0, %v2597_v44  ;;  %184 = vmatprep.mubr.f32.mxu0 %v2790_v3  ;;  %v53_v44 = vld [vmem:[%s3798_s0 + $0x38] sm:$0xff] }
  0xe9   :  { %2598 = vrcp.f32 %v288_v45 }
  0xea   :  { %2526 = vmatmul.mubr.msk.f32.gmra.mxu0 %vm65_vm0, %v51_v42 }
  0xeb   :  { %190 = vmatprep.mubr.f32.mxu0 %v2790_v3 }
  0xee   :  { %2527 = vmatmul.mubr.msk.f32.gmra.mxu0 %vm65_vm0, %v52_v43 }
  0xef   :  { %196 = vmatprep.mubr.f32.mxu0 %v2790_v3 }
  0xf2   :  { %2528 = vmatmul.mubr.msk.f32.gmra.mxu0 %vm65_vm0, %v53_v44 }
  0xf3   :  { %505 = vmatprep.mubr.f32.mxu0 %v2790_v3 }
  0xf6   :  { %v2599_v46 = vpop.eup %2598 }
  0xf7   :  { %v293_v50 = vmul.f32 0.0, %v2599_v46 }
 0x157   :  { %v296_v47 = vpop.permute.xlu0 %295 }
 0x158   :  { %v298_v48 = vmul.f32 %v2599_v46, %v296_v47 }
 0x15a   :  { %300 = vrot.lane.b32.xlu0 %v298_v48, %s2791_s2 }
 0x1cc   :  { %v301_v51 = vpop.permute.xlu0 %300 }
 0x1cd   :  { %v303_v52 = vadd.f32 %v301_v51, %v293_v50 }
 0x1cf   :  { %2600 = vtanh.f32 %v303_v52 }
 0x1d0   :  { %2602 = vpow2.f32 %v286_v55 }
 0x1dc   :  { %v2601_v53 = vpop.eup %2600 }
 0x1dd   :  { %306 = vrot.lane.b32.xlu1 %v2601_v53, %s2791_s2  ;;  %v2603_v56 = vpop.eup %2602  ;;  %v318_v53 = vld [vmem:[%s3799_s1 + $0x8] sm:$0xff] }
 0x1de   :  { %v289_v57 = vadd.f32 1.0, %v2603_v56  ;;  %vm319_vm3 = vcmp.gt.f32.partialorder %v318_v53, 0.5  ;;  %v436_v53 = vld [vmem:[%s3799_s1 + $0x10] sm:$0xff] }
 0x1df   :  { %vm437_vm4 = vcmp.gt.f32.partialorder %v436_v53, 0.5 }
 0x1e0   :  { %2604 = vrcp.f32 %v289_v57 }
 0x1e1   :  { %312 = vrot.lane.b32.xlu1 %v303_v52, %s2791_s2 }
 0x1ed   :  { %v2605_v59 = vpop.eup %2604 }
 0x24f   :  { %v307_v60 = vpop.permute.xlu1 %306 }
 0x250   :  { %v309_v61 = vmul.f32 %v2605_v59, %v307_v60 }
 0x252   :  { %v3015_v62 = vsel %vm204_vm1, %v309_v61, 0.0  ;;  %v168_v61 = vpop.f32.mrf.mxu0 }
 0x253   :  { %316 = vst.msk [vmem:[#allocation2] sm:$0xff] %vm205_vm2, %v3015_v62  ;;  %317 = vst.msk [vmem:[#allocation3 + $0x38] sm:$0xff] %vm205_vm2, %v3015_v62  ;;  %2529 = vmatmul.mubr.msk.f32.vlgmr.msra.gmra.mxu1 %vm205_vm2, %v3015_v62  ;;  %v313_v63 = vpop.permute.xlu1 %312 }
 0x254   :  { %v3023_v5 = vsel %vm204_vm1, %v313_v63, 0.0  ;;  %576 = vmatpush1.msra.mxu1 %v2831_v1  ;;  %623 = vmatprep.mubr.f32.mxu1 %v2790_v3  ;;  %vm2792_vm1 = vmmov 0  }
 0x255   :  { %408 = vrot.lane.b32.xlu1 %v3023_v5, %s2791_s2  ;;  %577 = vmatprep.subr.mxu1 %v2836_v2 }
 0x256   :  { %578 = vmatpush1.msra.mxu1 %v2844_v4 }
 0x257   :  { %579 = vmatprep.subr.mxu1 %v2853_v6 }
 0x258   :  { %580 = vmatpush1.msra.mxu1 %v2865_v9 }
 0x259   :  { %581 = vmatprep.subr.mxu1 %v2874_v11 }
 0x25a   :  { %582 = vmatpush1.msra.mxu1 %v2886_v14 }
 0x25b   :  { %583 = vmatprep.subr.mxu1 %v2895_v16 }
 0x25c   :  { %584 = vmatpush1.msra.mxu1 %v2904_v18 }
 0x25d   :  { %585 = vmatprep.subr.mxu1 %v2913_v20 }
 0x25e   :  { %586 = vmatpush1.msra.mxu1 %v2919_v21 }
 0x25f   :  { %587 = vmatprep.subr.mxu1 %v2926_v22 }
 0x260   :  { %588 = vmatpush1.msra.mxu1 %v2932_v23 }
 0x261   :  { %589 = vmatprep.subr.mxu1 %v2939_v24 }
 0x262   :  { %590 = vmatpush1.msra.mxu1 %v2946_v25 }
 0x263   :  { %811 = vmatprep.subr.mxu1 %v2826_v0 }
 0x2c7   :  { %v409_v45 = vpop.permute.xlu1 %408 }
 0x313   :  { %v389_v12 = vpop.f32.mrf.mxu1 }
 0x314   :  { %v394_v15 = vadd.f32 %v389_v12, %v163_v8 }
 0x315   :  { %v391_v17 = vpop.f32.mrf.mxu1 }
 0x316   :  { %v395_v19 = vadd.f32 %v391_v17, %v165_v13  ;;  %v396_v29 = vsub.f32 0.0, %v394_v15 }
 0x318   :  { %2606 = vtanh.f32 %v395_v19  ;;  %v398_v32 = vmul.f32 1.442695, %v396_v29  ;;  %v397_v50 = vsub.f32 0.0, %v395_v19 }
 0x31a   :  { %2608 = vpow2.f32 %v398_v32  ;;  %v400_v51 = vmul.f32 1.442695, %v397_v50 }
 0x325   :  { %v2607_v26 = vpop.eup %2606 }
 0x326   :  { %413 = vrot.lane.b32.xlu0 %v2607_v26, %s2791_s2  ;;  %v169_v26 = vadd.f32 %v168_v61, %v2994_v30 }
 0x327   :  { %v2609_v33 = vpop.eup %2608 }
 0x328   :  { %v402_v35 = vadd.f32 1.0, %v2609_v33 }
 0x32a   :  { %2610 = vrcp.f32 %v402_v35 }
 0x337   :  { %v2611_v36 = vpop.eup %2610 }
 0x338   :  { %v411_v46 = vmul.f32 %v2611_v36, %v409_v45 }
 0x398   :  { %v414_v37 = vpop.permute.xlu0 %413 }
 0x399   :  { %v416_v38 = vmul.f32 %v2611_v36, %v414_v37 }
 0x39b   :  { %418 = vrot.lane.b32.xlu0 %v416_v38, %s2791_s2 }
 0x40d   :  { %v419_v47 = vpop.permute.xlu0 %418 }
 0x40e   :  { %v421_v48 = vadd.f32 %v419_v47, %v411_v46 }
 0x410   :  { %2612 = vtanh.f32 %v421_v48  ;;  %430 = vrot.lane.b32.xlu0 %v421_v48, %s2791_s2 }
 0x411   :  { %2614 = vpow2.f32 %v400_v51 }
 0x41d   :  { %v2613_v49 = vpop.eup %2612 }
 0x41e   :  { %424 = vrot.lane.b32.xlu1 %v2613_v49, %s2791_s2  ;;  %v2615_v52 = vpop.eup %2614 }
 0x41f   :  { %v403_v54 = vadd.f32 1.0, %v2615_v52 }
 0x421   :  { %2616 = vrcp.f32 %v403_v54 }
 0x42e   :  { %v2617_v57 = vpop.eup %2616 }
 0x482   :  { %v431_v55 = vpop.permute.xlu0 %430 }
 0x483   :  { %v3084_v56 = vsel %vm319_vm3, %v431_v55, %v3023_v5 }
 0x484   :  { %526 = vrot.lane.b32.xlu0 %v3084_v56, %s2791_s2 }
 0x490   :  { %v425_v58 = vpop.permute.xlu1 %424 }
 0x491   :  { %v427_v59 = vmul.f32 %v2617_v57, %v425_v58 }
 0x493   :  { %v3089_v60 = vsel %vm319_vm3, %v427_v59, %v3015_v62  ;;  %v170_v62 = vpop.f32.mrf.mxu0 }
 0x494   :  { %434 = vst.msk [vmem:[#allocation2 + $0x8] sm:$0xff] %vm205_vm2, %v3089_v60  ;;  %435 = vst.msk [vmem:[#allocation3 + $0x30] sm:$0xff] %vm205_vm2, %v3089_v60  ;;  %2530 = vmatmul.mubr.msk.f32.vlgmr.msra.gmra.mxu0 %vm205_vm2, %v3089_v60  ;;  %v171_v32 = vadd.f32 %v170_v62, %v3000_v34 }
 0x495   :  { %694 = vmatpush1.msra.mxu0 %v2831_v1  ;;  %741 = vmatprep.mubr.f32.mxu0 %v2790_v3  ;;  %v3114_v63 = vpop.f32.mrf.mxu0 }
 0x496   :  { %695 = vmatprep.subr.mxu0 %v2836_v2 }
 0x497   :  { %696 = vmatpush1.msra.mxu0 %v2844_v4  ;;  %v3116_v5 = vpop.f32.mrf.mxu0 }
 0x498   :  { %697 = vmatprep.subr.mxu0 %v2853_v6 }
 0x499   :  { %698 = vmatpush1.msra.mxu0 %v2865_v9  ;;  %v3118_v7 = vpop.f32.mrf.mxu0 }
 0x49a   :  { %699 = vmatprep.subr.mxu0 %v2874_v11 }
 0x49b   :  { %700 = vmatpush1.msra.mxu0 %v2886_v14  ;;  %v3120_v8 = vpop.f32.mrf.mxu0 }
 0x49c   :  { %701 = vmatprep.subr.mxu0 %v2895_v16 }
 0x49d   :  { %702 = vmatpush1.msra.mxu0 %v2904_v18  ;;  %v3122_v10 = vpop.f32.mrf.mxu0 }
 0x49e   :  { %703 = vmatprep.subr.mxu0 %v2913_v20 }
 0x49f   :  { %704 = vmatpush1.msra.mxu0 %v2919_v21  ;;  %v3124_v12 = vpop.f32.mrf.mxu0 }
 0x4a0   :  { %705 = vmatprep.subr.mxu0 %v2926_v22 }
 0x4a1   :  { %706 = vmatpush1.msra.mxu0 %v2932_v23  ;;  %v3126_v13 = vpop.f32.mrf.mxu0 }
 0x4a2   :  { %707 = vmatprep.subr.mxu0 %v2939_v24 }
 0x4a3   :  { %708 = vmatpush1.msra.mxu0 %v2946_v25  ;;  %v3128_v15 = vpop.f32.mrf.mxu0 }
 0x4a4   :  { %929 = vmatprep.subr.mxu0 %v2826_v0 }
 0x4a5   :  { %v3130_v17 = vpop.f32.mrf.mxu0 }
 0x4a7   :  { %v3132_v19 = vpop.f32.mrf.mxu0 }
 0x4f6   :  { %v527_v45 = vpop.permute.xlu0 %526 }
 0x554   :  { %v507_v29 = vpop.f32.mrf.mxu0 }
 0x555   :  { %v512_v33 = vadd.f32 %v507_v29, %v169_v26  ;;  %v177_v26 = vadd.f32 %v3116_v5, %v3000_v34 }
 0x556   :  { %v509_v35 = vpop.f32.mrf.mxu0 }
 0x557   :  { %v513_v36 = vadd.f32 %v509_v35, %v171_v32  ;;  %v514_v38 = vsub.f32 0.0, %v512_v33 }
 0x559   :  { %2618 = vtanh.f32 %v513_v36  ;;  %v516_v39 = vmul.f32 1.442695, %v514_v38  ;;  %v515_v50 = vsub.f32 0.0, %v513_v36 }
 0x55b   :  { %2620 = vpow2.f32 %v516_v39  ;;  %v518_v51 = vmul.f32 1.442695, %v515_v50 }
 0x566   :  { %v2619_v37 = vpop.eup %2618 }
 0x567   :  { %531 = vrot.lane.b32.xlu1 %v2619_v37, %s2791_s2 }
 0x568   :  { %v2621_v40 = vpop.eup %2620 }
 0x569   :  { %v520_v41 = vadd.f32 1.0, %v2621_v40 }
 0x56b   :  { %2622 = vrcp.f32 %v520_v41 }
 0x578   :  { %v2623_v42 = vpop.eup %2622 }
 0x579   :  { %v529_v46 = vmul.f32 %v2623_v42, %v527_v45 }
 0x5d9   :  { %v532_v43 = vpop.permute.xlu1 %531 }
 0x5da   :  { %v534_v44 = vmul.f32 %v2623_v42, %v532_v43 }
 0x5dc   :  { %536 = vrot.lane.b32.xlu1 %v534_v44, %s2791_s2 }
 0x64e   :  { %v537_v47 = vpop.permute.xlu1 %536 }
 0x64f   :  { %v539_v48 = vadd.f32 %v537_v47, %v529_v46 }
 0x651   :  { %2624 = vtanh.f32 %v539_v48  ;;  %548 = vrot.lane.b32.xlu1 %v539_v48, %s2791_s2  ;;  %v554_v48 = vld [vmem:[%s3799_s1 + $0x18] sm:$0xff] }
 0x652   :  { %2626 = vpow2.f32 %v518_v51  ;;  %vm555_vm5 = vcmp.gt.f32.partialorder %v554_v48, 0.5 }
 0x65e   :  { %v2625_v49 = vpop.eup %2624 }
 0x65f   :  { %542 = vrot.lane.b32.xlu0 %v2625_v49, %s2791_s2  ;;  %v2627_v52 = vpop.eup %2626 }
 0x660   :  { %v521_v54 = vadd.f32 1.0, %v2627_v52 }
 0x662   :  { %2628 = vrcp.f32 %v521_v54 }
 0x66f   :  { %v2629_v58 = vpop.eup %2628 }
 0x6c3   :  { %v549_v55 = vpop.permute.xlu1 %548 }
 0x6c4   :  { %v3144_v57 = vsel %vm437_vm4, %v549_v55, %v3084_v56  ;;  %v175_v56 = vadd.f32 %v3114_v63, %v2994_v30 }
 0x6c5   :  { %644 = vrot.lane.b32.xlu1 %v3144_v57, %s2791_s2 }
 0x6d1   :  { %v543_v59 = vpop.permute.xlu0 %542 }
 0x6d2   :  { %v545_v61 = vmul.f32 %v2629_v58, %v543_v59  ;;  %v183_v59 = vadd.f32 %v3120_v8, %v3000_v34 }
 0x6d4   :  { %v3149_v62 = vsel %vm437_vm4, %v545_v61, %v3089_v60  ;;  %vm2514_vm4 = vcmask 7168  }
 0x6d5   :  { %552 = vst.msk [vmem:[#allocation2 + $0x10] sm:$0xff] %vm205_vm2, %v3149_v62  ;;  %553 = vst.msk [vmem:[#allocation3 + $0x28] sm:$0xff] %vm205_vm2, %v3149_v62  ;;  %2531 = vmatmul.mubr.msk.f32.vlgmr.msra.gmra.mxu1 %vm205_vm2, %v3149_v62 }
 0x6d6   :  { %812 = vmatpush1.msra.mxu1 %v2831_v1  ;;  %859 = vmatprep.mubr.f32.mxu1 %v2790_v3 }
 0x6d7   :  { %813 = vmatprep.subr.mxu1 %v2836_v2 }
 0x6d8   :  { %814 = vmatpush1.msra.mxu1 %v2844_v4 }
 0x6d9   :  { %815 = vmatprep.subr.mxu1 %v2853_v6 }
 0x6da   :  { %816 = vmatpush1.msra.mxu1 %v2865_v9 }
 0x6db   :  { %817 = vmatprep.subr.mxu1 %v2874_v11 }
 0x6dc   :  { %818 = vmatpush1.msra.mxu1 %v2886_v14 }
 0x6dd   :  { %819 = vmatprep.subr.mxu1 %v2895_v16 }
 0x6de   :  { %820 = vmatpush1.msra.mxu1 %v2904_v18 }
 0x6df   :  { %821 = vmatprep.subr.mxu1 %v2913_v20 }
 0x6e0   :  { %822 = vmatpush1.msra.mxu1 %v2919_v21 }
 0x6e1   :  { %823 = vmatprep.subr.mxu1 %v2926_v22 }
 0x6e2   :  { %824 = vmatpush1.msra.mxu1 %v2932_v23 }
 0x6e3   :  { %825 = vmatprep.subr.mxu1 %v2939_v24 }
 0x6e4   :  { %826 = vmatpush1.msra.mxu1 %v2946_v25 }
 0x6e5   :  { %1047 = vmatprep.subr.mxu1 %v2826_v0 }
 0x737   :  { %v645_v41 = vpop.permute.xlu1 %644 }
 0x795   :  { %v625_v60 = vpop.f32.mrf.mxu1 }
 0x796   :  { %v630_v29 = vadd.f32 %v625_v60, %v175_v56 }
 0x797   :  { %v627_v32 = vpop.f32.mrf.mxu1 }
 0x798   :  { %v631_v33 = vadd.f32 %v627_v32, %v177_v26  ;;  %v632_v36 = vsub.f32 0.0, %v630_v29 }
 0x79a   :  { %2630 = vtanh.f32 %v631_v33  ;;  %v634_v37 = vmul.f32 1.442695, %v632_v36  ;;  %v633_v45 = vsub.f32 0.0, %v631_v33 }
 0x79c   :  { %2632 = vpow2.f32 %v634_v37  ;;  %v636_v46 = vmul.f32 1.442695, %v633_v45 }
 0x7a7   :  { %v2631_v35 = vpop.eup %2630 }
 0x7a8   :  { %649 = vrot.lane.b32.xlu0 %v2631_v35, %s2791_s2 }
 0x7a9   :  { %v2633_v38 = vpop.eup %2632 }
 0x7aa   :  { %v638_v39 = vadd.f32 1.0, %v2633_v38 }
 0x7ac   :  { %2634 = vrcp.f32 %v638_v39 }
 0x7b9   :  { %v2635_v0 = vpop.eup %2634 }
 0x7ba   :  { %v647_v5 = vmul.f32 %v2635_v0, %v645_v41 }
 0x81a   :  { %v650_v40 = vpop.permute.xlu0 %649 }
 0x81b   :  { %v652_v63 = vmul.f32 %v2635_v0, %v650_v40 }
 0x81d   :  { %654 = vrot.lane.b32.xlu0 %v652_v63, %s2791_s2 }
 0x88f   :  { %v655_v42 = vpop.permute.xlu0 %654 }
 0x890   :  { %v657_v43 = vadd.f32 %v655_v42, %v647_v5  ;;  %v672_v5 = vld [vmem:[%s3799_s1 + $0x20] sm:$0xff] }
 0x891   :  { %vm673_vm6 = vcmp.gt.f32.partialorder %v672_v5, 0.5  ;;  %v1154_v5 = vld [vmem:[%s3800_s3 + $0x78] sm:$0xff] }
 0x892   :  { %2636 = vtanh.f32 %v657_v43  ;;  %666 = vrot.lane.b32.xlu0 %v657_v43, %s2791_s2 }
 0x893   :  { %2638 = vpow2.f32 %v636_v46 }
 0x89f   :  { %v2637_v44 = vpop.eup %2636 }
 0x8a0   :  { %660 = vrot.lane.b32.xlu1 %v2637_v44, %s2791_s2  ;;  %v2639_v47 = vpop.eup %2638 }
 0x8a1   :  { %v639_v49 = vadd.f32 1.0, %v2639_v47 }
 0x8a3   :  { %2640 = vrcp.f32 %v639_v49 }
 0x8b0   :  { %v2641_v52 = vpop.eup %2640 }
 0x904   :  { %v667_v50 = vpop.permute.xlu0 %666 }
 0x905   :  { %v669_v51 = vsel %vm555_vm5, %v667_v50, %v3144_v57  ;;  %v181_v57 = vadd.f32 %v3118_v7, %v2994_v30 }
 0x906   :  { %762 = vrot.lane.b32.xlu0 %v669_v51, %s2791_s2 }
 0x912   :  { %v661_v53 = vpop.permute.xlu1 %660 }
 0x913   :  { %v663_v54 = vmul.f32 %v2641_v52, %v661_v53 }
 0x915   :  { %v664_v55 = vsel %vm555_vm5, %v663_v54, %v3149_v62  ;;  %v790_v54 = vld [vmem:[%s3799_s1 + $0x28] sm:$0xff] }
 0x916   :  { %670 = vst.msk [vmem:[#allocation2 + $0x18] sm:$0xff] %vm205_vm2, %v664_v55  ;;  %671 = vst.msk [vmem:[#allocation3 + $0x20] sm:$0xff] %vm205_vm2, %v664_v55  ;;  %2532 = vmatmul.mubr.msk.f32.vlgmr.msra.gmra.mxu0 %vm205_vm2, %v664_v55  ;;  %vm791_vm7 = vcmp.gt.f32.partialorder %v790_v54, 0.5  ;;  %v1191_v54 = vld [vmem:[#allocation2 + $0x10] sm:$0xff] }
 0x917   :  { %930 = vmatpush1.msra.mxu0 %v2831_v1  ;;  %977 = vmatprep.mubr.f32.mxu0 %v2790_v3 }
 0x918   :  { %931 = vmatprep.subr.mxu0 %v2836_v2 }
 0x919   :  { %932 = vmatpush1.msra.mxu0 %v2844_v4 }
 0x91a   :  { %933 = vmatprep.subr.mxu0 %v2853_v6 }
 0x91b   :  { %934 = vmatpush1.msra.mxu0 %v2865_v9 }
 0x91c   :  { %935 = vmatprep.subr.mxu0 %v2874_v11 }
 0x91d   :  { %936 = vmatpush1.msra.mxu0 %v2886_v14 }
 0x91e   :  { %937 = vmatprep.subr.mxu0 %v2895_v16 }
 0x91f   :  { %938 = vmatpush1.msra.mxu0 %v2904_v18 }
 0x920   :  { %939 = vmatprep.subr.mxu0 %v2913_v20 }
 0x921   :  { %940 = vmatpush1.msra.mxu0 %v2919_v21 }
 0x922   :  { %941 = vmatprep.subr.mxu0 %v2926_v22 }
 0x923   :  { %942 = vmatpush1.msra.mxu0 %v2932_v23 }
 0x924   :  { %943 = vmatprep.subr.mxu0 %v2939_v24 }
 0x925   :  { %944 = vmatpush1.msra.mxu0 %v2946_v25 }
 0x978   :  { %v763_v37 = vpop.permute.xlu0 %762 }
 0x9d6   :  { %v743_v58 = vpop.f32.mrf.mxu0 }
 0x9d7   :  { %v748_v61 = vadd.f32 %v743_v58, %v181_v57 }
 0x9d8   :  { %v745_v62 = vpop.f32.mrf.mxu0 }
 0x9d9   :  { %v749_v56 = vadd.f32 %v745_v62, %v183_v59  ;;  %v750_v26 = vsub.f32 0.0, %v748_v61 }
 0x9db   :  { %2642 = vtanh.f32 %v749_v56  ;;  %v752_v29 = vmul.f32 1.442695, %v750_v26  ;;  %v751_v40 = vsub.f32 0.0, %v749_v56 }
 0x9dd   :  { %2644 = vpow2.f32 %v752_v29  ;;  %v754_v63 = vmul.f32 1.442695, %v751_v40  ;;  %v195_v29 = vadd.f32 %v3128_v15, %v3000_v34 }
 0x9e8   :  { %v2643_v60 = vpop.eup %2642 }
 0x9e9   :  { %767 = vrot.lane.b32.xlu1 %v2643_v60, %s2791_s2  ;;  %v193_v60 = vadd.f32 %v3126_v13, %v2994_v30 }
 0x9ea   :  { %v2645_v32 = vpop.eup %2644 }
 0x9eb   :  { %v756_v33 = vadd.f32 1.0, %v2645_v32 }
 0x9ed   :  { %2646 = vrcp.f32 %v756_v33 }
 0x9fa   :  { %v2647_v35 = vpop.eup %2646 }
 0x9fb   :  { %v765_v8 = vmul.f32 %v2647_v35, %v763_v37 }
 0xa5b   :  { %v768_v36 = vpop.permute.xlu1 %767 }
 0xa5c   :  { %v770_v7 = vmul.f32 %v2647_v35, %v768_v36 }
 0xa5e   :  { %772 = vrot.lane.b32.xlu1 %v770_v7, %s2791_s2 }
 0xad0   :  { %v773_v38 = vpop.permute.xlu1 %772 }
 0xad1   :  { %v775_v39 = vadd.f32 %v773_v38, %v765_v8 }
 0xad3   :  { %2648 = vtanh.f32 %v775_v39  ;;  %784 = vrot.lane.b32.xlu1 %v775_v39, %s2791_s2 }
 0xad4   :  { %2650 = vpow2.f32 %v754_v63 }
 0xae0   :  { %v2649_v0 = vpop.eup %2648 }
 0xae1   :  { %778 = vrot.lane.b32.xlu0 %v2649_v0, %s2791_s2  ;;  %v2651_v41 = vpop.eup %2650 }
 0xae2   :  { %v757_v42 = vadd.f32 1.0, %v2651_v41 }
 0xae4   :  { %2652 = vrcp.f32 %v757_v42 }
 0xaf1   :  { %v2653_v45 = vpop.eup %2652 }
 0xb45   :  { %v785_v43 = vpop.permute.xlu1 %784 }
 0xb46   :  { %v787_v44 = vsel %vm673_vm6, %v785_v43, %v669_v51 }
 0xb47   :  { %880 = vrot.lane.b32.xlu1 %v787_v44, %s2791_s2 }
 0xb53   :  { %v779_v46 = vpop.permute.xlu0 %778 }
 0xb54   :  { %v781_v47 = vmul.f32 %v2653_v45, %v779_v46  ;;  %v908_v46 = vld [vmem:[%s3799_s1 + $0x30] sm:$0xff] }
 0xb55   :  { %vm909_vm8 = vcmp.gt.f32.partialorder %v908_v46, 0.5  ;;  %v1158_v46 = vld [vmem:[%s3800_s3 + $0x98] sm:$0xff] }
 0xb56   :  { %v782_v48 = vsel %vm673_vm6, %v781_v47, %v664_v55 }
 0xb57   :  { %788 = vst.msk [vmem:[#allocation2 + $0x20] sm:$0xff] %vm205_vm2, %v782_v48  ;;  %789 = vst.msk [vmem:[#allocation3 + $0x18] sm:$0xff] %vm205_vm2, %v782_v48  ;;  %2533 = vmatmul.mubr.msk.f32.vlgmr.msra.gmra.mxu1 %vm205_vm2, %v782_v48 }
 0xb58   :  { %1048 = vmatpush1.msra.mxu1 %v2831_v1  ;;  %1095 = vmatprep.mubr.f32.mxu1 %v2790_v3  ;;  %v187_v1 = vadd.f32 %v3122_v10, %v2994_v30 }
 0xb59   :  { %1049 = vmatprep.subr.mxu1 %v2836_v2 }
 0xb5a   :  { %1050 = vmatpush1.msra.mxu1 %v2844_v4  ;;  %v189_v4 = vadd.f32 %v3124_v12, %v3000_v34 }
 0xb5b   :  { %1051 = vmatprep.subr.mxu1 %v2853_v6 }
 0xb5c   :  { %1052 = vmatpush1.msra.mxu1 %v2865_v9 }
 0xb5d   :  { %1053 = vmatprep.subr.mxu1 %v2874_v11 }
 0xb5e   :  { %1054 = vmatpush1.msra.mxu1 %v2886_v14 }
 0xb5f   :  { %1055 = vmatprep.subr.mxu1 %v2895_v16 }
 0xb60   :  { %1056 = vmatpush1.msra.mxu1 %v2904_v18 }
 0xb61   :  { %1057 = vmatprep.subr.mxu1 %v2913_v20 }
 0xb62   :  { %1058 = vmatpush1.msra.mxu1 %v2919_v21 }
 0xb63   :  { %1059 = vmatprep.subr.mxu1 %v2926_v22 }
 0xb64   :  { %1060 = vmatpush1.msra.mxu1 %v2932_v23 }
 0xb65   :  { %1061 = vmatprep.subr.mxu1 %v2939_v24 }
 0xb66   :  { %1062 = vmatpush1.msra.mxu1 %v2946_v25 }
 0xb67   :  { %1382 = vmatprep.subr.mxu1 %v1154_v5  ;;  %v1163_v5 = vld [vmem:[%s3800_s3 + $0xc0] sm:$0xff] }
 0xbb9   :  { %v881_v25 = vpop.permute.xlu1 %880 }
 0xc17   :  { %v861_v2 = vpop.f32.mrf.mxu1 }
 0xc18   :  { %v866_v6 = vadd.f32 %v861_v2, %v187_v1 }
 0xc19   :  { %v863_v9 = vpop.f32.mrf.mxu1 }
 0xc1a   :  { %v867_v11 = vadd.f32 %v863_v9, %v189_v4  ;;  %v868_v16 = vsub.f32 0.0, %v866_v6  ;;  %v1153_v9 = vld [vmem:[%s3800_s3 + $0x70] sm:$0xff] }
 0xc1c   :  { %2654 = vtanh.f32 %v867_v11  ;;  %v870_v18 = vmul.f32 1.442695, %v868_v16  ;;  %v869_v51 = vsub.f32 0.0, %v867_v11  ;;  %v1151_v16 = vld [vmem:[%s3800_s3 + $0x60] sm:$0xff] }
 0xc1e   :  { %2656 = vpow2.f32 %v870_v18  ;;  %v872_v52 = vmul.f32 1.442695, %v869_v51  ;;  %v1150_v18 = vld [vmem:[%s3800_s3 + $0x58] sm:$0xff]  ;;  %v1139_v51 = vld [vmem:[%s3800_s3] sm:$0xff] }
 0xc29   :  { %v2655_v14 = vpop.eup %2654 }
 0xc2a   :  { %885 = vrot.lane.b32.xlu0 %v2655_v14, %s2791_s2  ;;  %v1152_v14 = vld [vmem:[%s3800_s3 + $0x68] sm:$0xff] }
 0xc2b   :  { %v2657_v20 = vpop.eup %2656 }
 0xc2c   :  { %v874_v21 = vadd.f32 1.0, %v2657_v20  ;;  %v1149_v20 = vld [vmem:[%s3800_s3 + $0x50] sm:$0xff] }
 0xc2e   :  { %2658 = vrcp.f32 %v874_v21  ;;  %v1148_v21 = vld [vmem:[%s3800_s3 + $0x48] sm:$0xff] }
 0xc3b   :  { %v2659_v22 = vpop.eup %2658 }
 0xc3c   :  { %v883_v10 = vmul.f32 %v2659_v22, %v881_v25  ;;  %v1144_v25 = vld [vmem:[%s3800_s3 + $0x28] sm:$0xff] }
 0xc9c   :  { %v886_v23 = vpop.permute.xlu0 %885 }
 0xc9d   :  { %v888_v24 = vmul.f32 %v2659_v22, %v886_v23  ;;  %v1147_v22 = vld [vmem:[%s3800_s3 + $0x40] sm:$0xff]  ;;  %v1146_v23 = vld [vmem:[%s3800_s3 + $0x38] sm:$0xff] }
 0xc9f   :  { %890 = vrot.lane.b32.xlu0 %v888_v24, %s2791_s2  ;;  %v1145_v24 = vld [vmem:[%s3800_s3 + $0x30] sm:$0xff] }
 0xd11   :  { %v891_v12 = vpop.permute.xlu0 %890 }
 0xd12   :  { %v893_v49 = vadd.f32 %v891_v12, %v883_v10  ;;  %v1143_v10 = vld [vmem:[%s3800_s3 + $0x20] sm:$0xff]  ;;  %v1142_v12 = vld [vmem:[%s3800_s3 + $0x18] sm:$0xff] }
 0xd14   :  { %2660 = vtanh.f32 %v893_v49  ;;  %902 = vrot.lane.b32.xlu0 %v893_v49, %s2791_s2  ;;  %v1141_v49 = vld [vmem:[%s3800_s3 + $0x10] sm:$0xff] }
 0xd15   :  { %2662 = vpow2.f32 %v872_v52  ;;  %v1189_v52 = vld [vmem:[#allocation2] sm:$0xff] }
 0xd21   :  { %v2661_v50 = vpop.eup %2660 }
 0xd22   :  { %896 = vrot.lane.b32.xlu1 %v2661_v50, %s2791_s2  ;;  %v2663_v53 = vpop.eup %2662  ;;  %v1140_v50 = vld [vmem:[%s3800_s3 + $0x8] sm:$0xff] }
 0xd23   :  { %v875_v55 = vadd.f32 1.0, %v2663_v53  ;;  %v1190_v53 = vld [vmem:[#allocation2 + $0x8] sm:$0xff] }
 0xd25   :  { %2664 = vrcp.f32 %v875_v55  ;;  %v1192_v55 = vld [vmem:[#allocation2 + $0x18] sm:$0xff] }
 0xd32   :  { %v2665_v59 = vpop.eup %2664 }
 0xd86   :  { %v903_v57 = vpop.permute.xlu0 %902 }
 0xd87   :  { %v905_v58 = vsel %vm791_vm7, %v903_v57, %v787_v44  ;;  %v1193_v57 = vld [vmem:[#allocation2 + $0x20] sm:$0xff] }
 0xd88   :  { %998 = vrot.lane.b32.xlu0 %v905_v58, %s2791_s2 }
 0xd94   :  { %v897_v61 = vpop.permute.xlu1 %896 }
 0xd95   :  { %v899_v62 = vmul.f32 %v2665_v59, %v897_v61  ;;  %v199_v61 = vadd.f32 %v3130_v17, %v2994_v30 }
 0xd97   :  { %v900_v56 = vsel %vm791_vm7, %v899_v62, %v782_v48 }
 0xd98   :  { %906 = vst.msk [vmem:[#allocation2 + $0x28] sm:$0xff] %vm205_vm2, %v900_v56  ;;  %907 = vst.msk [vmem:[#allocation3 + $0x10] sm:$0xff] %vm205_vm2, %v900_v56  ;;  %2534 = vmatmul.mubr.msk.f32.vlgmr.msra.gmra.mxu0 %vm205_vm2, %v900_v56 }
 0xd99   :  { %1293 = vmatprep.mubr.f32.mxu0 %v2790_v3 }
 0xdfa   :  { %v999_v40 = vpop.permute.xlu0 %998 }
 0xe58   :  { %v979_v26 = vpop.f32.mrf.mxu0 }
 0xe59   :  { %v984_v32 = vadd.f32 %v979_v26, %v193_v60 }
 0xe5a   :  { %v981_v33 = vpop.f32.mrf.mxu0 }
 0xe5b   :  { %v985_v35 = vadd.f32 %v981_v33, %v195_v29  ;;  %v986_v7 = vsub.f32 0.0, %v984_v32 }
 0xe5d   :  { %2666 = vtanh.f32 %v985_v35  ;;  %v988_v37 = vmul.f32 1.442695, %v986_v7  ;;  %v987_v43 = vsub.f32 0.0, %v985_v35 }
 0xe5f   :  { %2668 = vpow2.f32 %v988_v37  ;;  %v990_v44 = vmul.f32 1.442695, %v987_v43  ;;  %v1161_v43 = vld [vmem:[%s3800_s3 + $0xb0] sm:$0xff] }
 0xe6a   :  { %v2667_v36 = vpop.eup %2666 }
 0xe6b   :  { %1003 = vrot.lane.b32.xlu1 %v2667_v36, %s2791_s2 }
 0xe6c   :  { %v2669_v8 = vpop.eup %2668 }
 0xe6d   :  { %v992_v38 = vadd.f32 1.0, %v2669_v8  ;;  %v1168_v8 = vld [vmem:[%s3800_s3 + $0xe8] sm:$0xff] }
 0xe6f   :  { %2670 = vrcp.f32 %v992_v38  ;;  %v1167_v38 = vld [vmem:[%s3800_s3 + $0xe0] sm:$0xff] }
 0xe7c   :  { %v2671_v39 = vpop.eup %2670 }
 0xe7d   :  { %v1001_v15 = vmul.f32 %v2671_v39, %v999_v40 }
 0xedd   :  { %v1004_v0 = vpop.permute.xlu1 %1003 }
 0xede   :  { %v1006_v13 = vmul.f32 %v2671_v39, %v1004_v0  ;;  %v1166_v39 = vld [vmem:[%s3800_s3 + $0xd8] sm:$0xff]  ;;  %v1165_v0 = vld [vmem:[%s3800_s3 + $0xd0] sm:$0xff] }
 0xee0   :  { %1008 = vrot.lane.b32.xlu1 %v1006_v13, %s2791_s2 }
 0xf52   :  { %v1009_v63 = vpop.permute.xlu1 %1008 }
 0xf53   :  { %v1011_v41 = vadd.f32 %v1009_v63, %v1001_v15 }
 0xf55   :  { %2672 = vtanh.f32 %v1011_v41  ;;  %1020 = vrot.lane.b32.xlu1 %v1011_v41, %s2791_s2  ;;  %v1164_v41 = vld [vmem:[%s3800_s3 + $0xc8] sm:$0xff] }
 0xf56   :  { %2674 = vpow2.f32 %v990_v44  ;;  %v1160_v44 = vld [vmem:[%s3800_s3 + $0xa8] sm:$0xff] }
 0xf62   :  { %v2673_v42 = vpop.eup %2672 }
 0xf63   :  { %1014 = vrot.lane.b32.xlu0 %v2673_v42, %s2791_s2  ;;  %v2675_v45 = vpop.eup %2674  ;;  %v1162_v42 = vld [vmem:[%s3800_s3 + $0xb8] sm:$0xff] }
 0xf64   :  { %v993_v47 = vadd.f32 1.0, %v2675_v45  ;;  %v1159_v45 = vld [vmem:[%s3800_s3 + $0xa0] sm:$0xff] }
 0xf66   :  { %2676 = vrcp.f32 %v993_v47  ;;  %v3388_v47 = vld [vmem:[%s3800_s3 + $0x188] sm:$0xff] }
 0xf73   :  { %v2677_v2 = vpop.eup %2676 }
 0xfc7   :  { %v1021_v48 = vpop.permute.xlu1 %1020 }
 0xfc8   :  { %v1023_v1 = vsel %vm909_vm8, %v1021_v48, %v905_v58  ;;  %v1194_v58 = vld [vmem:[#allocation2 + $0x28] sm:$0xff]  ;;  %v1157_v48 = vld [vmem:[%s3800_s3 + $0x90] sm:$0xff] }
 0xfc9   :  { %1116 = vrot.lane.b32.xlu1 %v1023_v1, %s2791_s2  ;;  %v1156_v1 = vld [vmem:[%s3800_s3 + $0x88] sm:$0xff] }
 0xfd5   :  { %v1015_v4 = vpop.permute.xlu0 %1014 }
 0xfd6   :  { %v1017_v6 = vmul.f32 %v2677_v2, %v1015_v4  ;;  %v1155_v2 = vld [vmem:[%s3800_s3 + $0x80] sm:$0xff] }
 0xfd7   :  { %v3403_v4 = vld [vmem:[%s3800_s3 + $0x180] sm:$0xff] }
 0xfd8   :  { %v3272_v11 = vsel %vm909_vm8, %v1017_v6, %v900_v56  ;;  %v201_v56 = vadd.f32 %v3132_v19, %v3000_v34  ;;  %v1170_v34 = vld [vmem:[%s3800_s3 + $0xf8] sm:$0xff]  ;;  %v1169_v19 = vld [vmem:[%s3800_s3 + $0xf0] sm:$0xff] }
 0xfd9   :  { %1024 = vst.msk [vmem:[#allocation2 + $0x30] sm:$0xff] %vm205_vm2, %v3272_v11  ;;  %1025 = vst.msk [vmem:[#allocation3 + $0x8] sm:$0xff] %vm205_vm2, %v3272_v11  ;;  %2535 = vmatmul.mubr.msk.f32.vlgmr.msra.gmra.mxu1 %vm205_vm2, %v3272_v11  ;;  %1245 = vmatprep.subr.mxu0 %v1170_v34 }
 0xfda   :  { %1383 = vmatpush1.msra.mxu1 %v1153_v9  ;;  %1430 = vmatprep.mubr.f32.mxu1 %v2790_v3  ;;  %v3409_v9 = vld [vmem:[%s3800_s3 + $0x178] sm:$0xff] }
 0xfdb   :  { %1384 = vmatprep.subr.mxu1 %v1152_v14  ;;  %1246 = vmatpush1.msra.mxu0 %v1169_v19  ;;  %v3417_v14 = vld [vmem:[%s3800_s3 + $0x170] sm:$0xff] }
 0xfdc   :  { %1385 = vmatpush1.msra.mxu1 %v1151_v16  ;;  %1247 = vmatprep.subr.mxu0 %v1168_v8  ;;  %v3422_v16 = vld [vmem:[%s3800_s3 + $0x168] sm:$0xff] }
 0xfdd   :  { %1386 = vmatprep.subr.mxu1 %v1150_v18  ;;  %1248 = vmatpush1.msra.mxu0 %v1167_v38  ;;  %v3429_v18 = vld [vmem:[%s3800_s3 + $0x160] sm:$0xff] }
 0xfde   :  { %1387 = vmatpush1.msra.mxu1 %v1149_v20  ;;  %1249 = vmatprep.subr.mxu0 %v1166_v39  ;;  %v3434_v20 = vld [vmem:[%s3800_s3 + $0x158] sm:$0xff]  ;;  %v2536_v8 = vld [vmem:[%s3800_s3 + $0x100] ss:$8 sm:$0x3] }
 0xfdf   :  { %1388 = vmatprep.subr.mxu1 %v1148_v21  ;;  %1250 = vmatpush1.msra.mxu0 %v1165_v0  ;;  %v3441_v21 = vld [vmem:[%s3800_s3 + $0x150] sm:$0xff]  ;;  %v1483_v38 = vrot.slane %v2536_v8, %v57_v28 }
 0xfe0   :  { %1389 = vmatpush1.msra.mxu1 %v1147_v22  ;;  %v1195_v59 = vld [vmem:[#allocation2 + $0x30] sm:$0xff]  ;;  %1251 = vmatprep.subr.mxu0 %v1164_v41  ;;  %v3446_v22 = vld [vmem:[%s3800_s3 + $0x148] sm:$0xff] }
 0xfe1   :  { %1390 = vmatprep.subr.mxu1 %v1146_v23  ;;  %1252 = vmatpush1.msra.mxu0 %v1163_v5  ;;  %v3453_v23 = vld [vmem:[%s3800_s3 + $0x140] sm:$0xff] }
 0xfe2   :  { %1391 = vmatpush1.msra.mxu1 %v1145_v24  ;;  %1253 = vmatprep.subr.mxu0 %v1162_v42  ;;  %v3458_v24 = vld [vmem:[%s3800_s3 + $0x138] sm:$0xff] }
 0xfe3   :  { %1392 = vmatprep.subr.mxu1 %v1144_v25  ;;  %1254 = vmatpush1.msra.mxu0 %v1161_v43  ;;  %v3465_v25 = vld [vmem:[%s3800_s3 + $0x130] sm:$0xff] }
 0xfe4   :  { %1393 = vmatpush1.msra.mxu1 %v1143_v10  ;;  %1255 = vmatprep.subr.mxu0 %v1160_v44  ;;  %v3470_v10 = vld [vmem:[%s3800_s3 + $0x128] sm:$0xff]  ;;  %v1487_v44 = vrot.slane %v2536_v8, %v61_v31 }
 0xfe5   :  { %1394 = vmatprep.subr.mxu1 %v1142_v12  ;;  %1256 = vmatpush1.msra.mxu0 %v1159_v45  ;;  %v3477_v12 = vld [vmem:[%s3800_s3 + $0x120] sm:$0xff] }
 0xfe6   :  { %1395 = vmatpush1.msra.mxu1 %v1141_v49  ;;  %1257 = vmatprep.subr.mxu0 %v1158_v46  ;;  %v3482_v49 = vld [vmem:[%s3800_s3 + $0x118] sm:$0xff] }
 0xfe7   :  { %1396 = vmatprep.subr.mxu1 %v1140_v50  ;;  %1258 = vmatpush1.msra.mxu0 %v1157_v48  ;;  %v3489_v50 = vld [vmem:[%s3800_s3 + $0x110] sm:$0xff] }
 0xfe8   :  { %1397 = vmatpush1.msra.mxu1 %v1139_v51  ;;  %1259 = vmatprep.subr.mxu0 %v1156_v1 }
 0xfe9   :  { %2545 = vmatmul.mubr.msk.f32.vlgmr.msra.gmra.mxu1 %vm205_vm2, %v1189_v52  ;;  %1636 = vmatprep.subr.mxu1 %v3388_v47 }
 0xfea   :  { %1436 = vmatprep.mubr.f32.mxu1 %v2790_v3  ;;  %1260 = vmatpush1.msra.mxu0 %v1155_v2 }
 0xfeb   :  { %1524 = vmatprep.subr.mxu0 %v3388_v47  ;;  %1637 = vmatpush1.msra.mxu1 %v3403_v4 }
 0xfec   :  { %1638 = vmatprep.subr.mxu1 %v3409_v9 }
 0xfed   :  { %2546 = vmatmul.mubr.msk.f32.gmra.mxu1 %vm205_vm2, %v1190_v53 }
 0xfee   :  { %1442 = vmatprep.mubr.f32.mxu1 %v2790_v3  ;;  %1639 = vmatpush1.msra.mxu1 %v3417_v14 }
 0xfef   :  { %1640 = vmatprep.subr.mxu1 %v3422_v16 }
 0xff0   :  { %1641 = vmatpush1.msra.mxu1 %v3429_v18 }
 0xff1   :  { %2547 = vmatmul.mubr.msk.f32.gmra.mxu1 %vm205_vm2, %v1191_v54  ;;  %1642 = vmatprep.subr.mxu1 %v3434_v20 }
 0xff2   :  { %1448 = vmatprep.mubr.f32.mxu1 %v2790_v3  ;;  %1643 = vmatpush1.msra.mxu1 %v3441_v21 }
 0xff3   :  { %1644 = vmatprep.subr.mxu1 %v3446_v22 }
 0xff4   :  { %1645 = vmatpush1.msra.mxu1 %v3453_v23 }
 0xff5   :  { %2548 = vmatmul.mubr.msk.f32.gmra.mxu1 %vm205_vm2, %v1192_v55  ;;  %1646 = vmatprep.subr.mxu1 %v3458_v24  ;;  %v1026_v55 = vld [vmem:[%s3799_s1 + $0x38] sm:$0xff] }
 0xff6   :  { %1454 = vmatprep.mubr.f32.mxu1 %v2790_v3  ;;  %1647 = vmatpush1.msra.mxu1 %v3465_v25  ;;  %vm1027_vm9 = vcmp.gt.f32.partialorder %v1026_v55, 0.5 }
 0xff7   :  { %1648 = vmatprep.subr.mxu1 %v3470_v10 }
 0xff8   :  { %1649 = vmatpush1.msra.mxu1 %v3477_v12 }
 0xff9   :  { %2549 = vmatmul.mubr.msk.f32.gmra.mxu1 %vm205_vm2, %v1193_v57  ;;  %1650 = vmatprep.subr.mxu1 %v3482_v49 }
 0xffa   :  { %1460 = vmatprep.mubr.f32.mxu1 %v2790_v3  ;;  %1651 = vmatpush1.msra.mxu1 %v3489_v50 }
 0xffb   :  { %1868 = vmatprep.subr.mxu1 %v3388_v47 }
 0xffd   :  { %2550 = vmatmul.mubr.msk.f32.gmra.mxu1 %vm205_vm2, %v1194_v58 }
 0xffe   :  { %1466 = vmatprep.mubr.f32.mxu1 %v2790_v3 }
0x1001   :  { %2551 = vmatmul.mubr.msk.f32.gmra.mxu1 %vm205_vm2, %v1195_v59 }
0x1002   :  { %1472 = vmatprep.mubr.f32.mxu1 %v2790_v3 }
0x103b   :  { %v1117_v13 = vpop.permute.xlu1 %1116 }
0x1099   :  { %v1097_v62 = vpop.f32.mrf.mxu1 }
0x109a   :  { %v1102_v60 = vadd.f32 %v1097_v62, %v199_v61 }
0x109b   :  { %v1099_v26 = vpop.f32.mrf.mxu1 }
0x109c   :  { %v3341_v29 = vadd.f32 %v1099_v26, %v201_v56  ;;  %v1104_v33 = vsub.f32 0.0, %v1102_v60  ;;  %v1198_v60 = vld [vmem:[#allocation3 + $0x8] sm:$0xff]  ;;  %v1200_v26 = vld [vmem:[#allocation3 + $0x18] sm:$0xff] }
0x109e   :  { %2678 = vtanh.f32 %v3341_v29  ;;  %v1106_v35 = vmul.f32 1.442695, %v1104_v33  ;;  %v1105_v51 = vsub.f32 0.0, %v3341_v29  ;;  %v1201_v29 = vld [vmem:[#allocation3 + $0x20] sm:$0xff]  ;;  %v1203_v33 = vld [vmem:[#allocation3 + $0x30] sm:$0xff] }
0x10a0   :  { %2680 = vpow2.f32 %v1106_v35  ;;  %v1108_v52 = vmul.f32 1.442695, %v1105_v51  ;;  %v1204_v35 = vld [vmem:[#allocation3 + $0x38] sm:$0xff] }
0x10ab   :  { %v2679_v32 = vpop.eup %2678 }
0x10ac   :  { %1121 = vrot.lane.b32.xlu0 %v2679_v32, %s2791_s2  ;;  %v1202_v32 = vld [vmem:[#allocation3 + $0x28] sm:$0xff] }
0x10ad   :  { %v2681_v36 = vpop.eup %2680 }
0x10ae   :  { %v1110_v7 = vadd.f32 1.0, %v2681_v36  ;;  %v1432_v36 = vpop.f32.mrf.mxu1 }
0x10b0   :  { %2682 = vrcp.f32 %v1110_v7  ;;  %v1434_v7 = vpop.f32.mrf.mxu1 }
0x10bd   :  { %v2683_v30 = vpop.eup %2682 }
0x10be   :  { %v1119_v40 = vmul.f32 %v2683_v30, %v1117_v13 }
0x111e   :  { %v1122_v17 = vpop.permute.xlu0 %1121 }
0x111f   :  { %v1124_v37 = vmul.f32 %v2683_v30, %v1122_v17  ;;  %v1438_v30 = vpop.f32.mrf.mxu1 }
0x1121   :  { %1126 = vrot.lane.b32.xlu0 %v1124_v37, %s2791_s2  ;;  %v1440_v17 = vpop.f32.mrf.mxu1 }
0x1123   :  { %v1444_v37 = vpop.f32.mrf.mxu1 }
0x1125   :  { %v1446_v34 = vpop.f32.mrf.mxu1 }
0x1127   :  { %v1450_v19 = vpop.f32.mrf.mxu1 }
0x1129   :  { %v1452_v39 = vpop.f32.mrf.mxu1 }
0x1193   :  { %v1127_v15 = vpop.permute.xlu0 %1126 }
0x1194   :  { %v1129_v63 = vadd.f32 %v1127_v15, %v1119_v40 }
0x1196   :  { %2684 = vtanh.f32 %v1129_v63  ;;  %v1456_v63 = vpop.f32.mrf.mxu1 }
0x1197   :  { %2686 = vpow2.f32 %v1108_v52 }
0x1198   :  { %v1458_v46 = vpop.f32.mrf.mxu1 }
0x119a   :  { %v1462_v52 = vpop.f32.mrf.mxu1 }
0x119c   :  { %v1464_v31 = vpop.f32.mrf.mxu1 }
0x11a3   :  { %v2685_v6 = vpop.eup %2684 }
0x11a4   :  { %1132 = vrot.lane.b32.xlu1 %v2685_v6, %s2791_s2  ;;  %v2687_v53 = vpop.eup %2686 }
0x11a5   :  { %v1111_v54 = vadd.f32 1.0, %v2687_v53 }
0x11a7   :  { %2688 = vrcp.f32 %v1111_v54 }
0x11b4   :  { %v2689_v57 = vpop.eup %2688 }
0x1216   :  { %v1133_v58 = vpop.permute.xlu1 %1132 }
0x1217   :  { %v1135_v59 = vmul.f32 %v2689_v57, %v1133_v58 }
0x1219   :  { %v1136_v61 = vsel %vm1027_vm9, %v1135_v59, %v3272_v11  ;;  %v1199_v11 = vld [vmem:[#allocation3 + $0x10] sm:$0xff] }
0x121a   :  { %1137 = vst.msk [vmem:[#allocation2 + $0x38] sm:$0xff] %vm205_vm2, %v1136_v61  ;;  %1138 = vst.msk [vmem:[#allocation3] sm:$0xff] %vm205_vm2, %v1136_v61 }
0x1221   :  { %v1197_v62 = vld [vmem:[#allocation3] sm:$0xff]  ;;  %v1196_v56 = vld [vmem:[#allocation2 + $0x38] sm:$0xff] }
0x1222   :  { %2537 = vmatmul.mubr.msk.f32.vlgmr.msra.gmra.mxu0 %vm205_vm2, %v1197_v62  ;;  %2552 = vmatmul.mubr.msk.f32.gmra.mxu1 %vm205_vm2, %v1196_v56 }
0x1223   :  { %1525 = vmatpush1.msra.mxu0 %v3403_v4  ;;  %1299 = vmatprep.mubr.f32.mxu0 %v2790_v3 }
0x1224   :  { %1526 = vmatprep.subr.mxu0 %v3409_v9  ;;  %1684 = vmatprep.mubr.f32.mxu1 %v2790_v3 }
0x1225   :  { %1527 = vmatpush1.msra.mxu0 %v3417_v14 }
0x1226   :  { %2538 = vmatmul.mubr.msk.f32.gmra.mxu0 %vm205_vm2, %v1198_v60  ;;  %1528 = vmatprep.subr.mxu0 %v3422_v16 }
0x1227   :  { %1305 = vmatprep.mubr.f32.mxu0 %v2790_v3  ;;  %1529 = vmatpush1.msra.mxu0 %v3429_v18 }
0x1228   :  { %1530 = vmatprep.subr.mxu0 %v3434_v20 }
0x1229   :  { %1531 = vmatpush1.msra.mxu0 %v3441_v21 }
0x122a   :  { %2539 = vmatmul.mubr.msk.f32.gmra.mxu0 %vm205_vm2, %v1199_v11  ;;  %1532 = vmatprep.subr.mxu0 %v3446_v22 }
0x122b   :  { %1311 = vmatprep.mubr.f32.mxu0 %v2790_v3  ;;  %1533 = vmatpush1.msra.mxu0 %v3453_v23 }
0x122c   :  { %1534 = vmatprep.subr.mxu0 %v3458_v24 }
0x122d   :  { %1535 = vmatpush1.msra.mxu0 %v3465_v25 }
0x122e   :  { %2540 = vmatmul.mubr.msk.f32.gmra.mxu0 %vm205_vm2, %v1200_v26  ;;  %1536 = vmatprep.subr.mxu0 %v3470_v10  ;;  %v1468_v26 = vpop.f32.mrf.mxu1 }
0x122f   :  { %1317 = vmatprep.mubr.f32.mxu0 %v2790_v3  ;;  %1537 = vmatpush1.msra.mxu0 %v3477_v12 }
0x1230   :  { %1538 = vmatprep.subr.mxu0 %v3482_v49 }
0x1231   :  { %1539 = vmatpush1.msra.mxu0 %v3489_v50 }
0x1232   :  { %2541 = vmatmul.mubr.msk.f32.gmra.mxu0 %vm205_vm2, %v1201_v29  ;;  %1752 = vmatprep.subr.mxu0 %v3388_v47 }
0x1233   :  { %1323 = vmatprep.mubr.f32.mxu0 %v2790_v3 }
0x1236   :  { %2542 = vmatmul.mubr.msk.f32.gmra.mxu0 %vm205_vm2, %v1202_v32 }
0x1237   :  { %1329 = vmatprep.mubr.f32.mxu0 %v2790_v3 }
0x123a   :  { %2543 = vmatmul.mubr.msk.f32.gmra.mxu0 %vm205_vm2, %v1203_v33 }
0x123b   :  { %1335 = vmatprep.mubr.f32.mxu0 %v2790_v3 }
0x123e   :  { %2544 = vmatmul.mubr.msk.f32.gmra.mxu0 %vm205_vm2, %v1204_v35 }
0x123f   :  { %1572 = vmatprep.mubr.f32.mxu0 %v2790_v3 }
0x1242   :  { %1573 = vmatmul.mubr.f32.vlgmr.msra.gmra.mxu0 %v2790_v3 }
0x1243   :  { %1753 = vmatpush1.msra.mxu0 %v3403_v4  ;;  %1800 = vmatprep.mubr.f32.mxu0 %v2790_v3 }
0x1244   :  { %1754 = vmatprep.subr.mxu0 %v3409_v9 }
0x1245   :  { %1755 = vmatpush1.msra.mxu0 %v3417_v14 }
0x1246   :  { %1756 = vmatprep.subr.mxu0 %v3422_v16 }
0x1247   :  { %1757 = vmatpush1.msra.mxu0 %v3429_v18 }
0x1248   :  { %1758 = vmatprep.subr.mxu0 %v3434_v20 }
0x1249   :  { %1759 = vmatpush1.msra.mxu0 %v3441_v21 }
0x124a   :  { %1760 = vmatprep.subr.mxu0 %v3446_v22 }
0x124b   :  { %1761 = vmatpush1.msra.mxu0 %v3453_v23 }
0x124c   :  { %1762 = vmatprep.subr.mxu0 %v3458_v24 }
0x124d   :  { %1763 = vmatpush1.msra.mxu0 %v3465_v25 }
0x124e   :  { %1764 = vmatprep.subr.mxu0 %v3470_v10 }
0x124f   :  { %1765 = vmatpush1.msra.mxu0 %v3477_v12 }
0x1250   :  { %1766 = vmatprep.subr.mxu0 %v3482_v49 }
0x1251   :  { %1767 = vmatpush1.msra.mxu0 %v3489_v50 }
0x1252   :  { %1984 = vmatprep.subr.mxu0 %v3388_v47 }
0x12e2   :  { %v1295_v0 = vpop.f32.mrf.mxu0 }
0x12e3   :  { %v1433_v13 = vadd.f32 %v1432_v36, %v1295_v0 }
0x12e4   :  { %v1297_v40 = vpop.f32.mrf.mxu0 }
0x12e5   :  { %v1490_v15 = vadd.f32 %v1483_v38, %v1433_v13 }
0x12e6   :  { %v1301_v41 = vpop.f32.mrf.mxu0 }
0x12e7   :  { %v1439_v5 = vadd.f32 %v1438_v30, %v1301_v41  ;;  %v1435_v41 = vadd.f32 %v1434_v7, %v1297_v40 }
0x12e8   :  { %v1303_v42 = vpop.f32.mrf.mxu0 }
0x12e9   :  { %v1441_v43 = vadd.f32 %v1440_v17, %v1303_v42  ;;  %v3559_v45 = vadd.f32 %v1483_v38, %v1439_v5  ;;  %v1470_v17 = vpop.f32.mrf.mxu1 }
0x12ea   :  { %v1307_v48 = vpop.f32.mrf.mxu0 }
0x12eb   :  { %v1445_v1 = vadd.f32 %v1444_v37, %v1307_v48  ;;  %v3561_v2 = vadd.f32 %v1487_v44, %v1441_v43  ;;  %v1474_v8 = vpop.f32.mrf.mxu1 }
0x12ec   :  { %v1309_v28 = vpop.f32.mrf.mxu0 }
0x12ed   :  { %v1447_v6 = vadd.f32 %v1446_v34, %v1309_v28  ;;  %v3563_v51 = vadd.f32 %v1483_v38, %v1445_v1  ;;  %v1476_v43 = vpop.f32.mrf.mxu1 }
0x12ee   :  { %v1313_v53 = vpop.f32.mrf.mxu0 }
0x12ef   :  { %v1451_v54 = vadd.f32 %v1450_v19, %v1313_v53  ;;  %v3565_v55 = vadd.f32 %v1487_v44, %v1447_v6 }
0x12f0   :  { %v1315_v57 = vpop.f32.mrf.mxu0 }
0x12f1   :  { %v1453_v58 = vadd.f32 %v1452_v39, %v1315_v57  ;;  %v3567_v27 = vadd.f32 %v1483_v38, %v1451_v54 }
0x12f2   :  { %v1319_v59 = vpop.f32.mrf.mxu0 }
0x12f3   :  { %v1457_v61 = vadd.f32 %v1456_v63, %v1319_v59  ;;  %v3569_v62 = vadd.f32 %v1487_v44, %v1453_v58 }
0x12f4   :  { %v1321_v56 = vpop.f32.mrf.mxu0 }
0x12f5   :  { %v1459_v60 = vadd.f32 %v1458_v46, %v1321_v56  ;;  %v3571_v11 = vadd.f32 %v1483_v38, %v1457_v61 }
0x12f6   :  { %v1325_v29 = vpop.f32.mrf.mxu0 }
0x12f7   :  { %v1463_v32 = vadd.f32 %v1462_v52, %v1325_v29  ;;  %v3573_v33 = vadd.f32 %v1487_v44, %v1459_v60  ;;  %v1491_v52 = vadd.f32 %v1487_v44, %v1435_v41 }
0x12f8   :  { %v1327_v35 = vpop.f32.mrf.mxu0 }
0x12f9   :  { %v1465_v36 = vadd.f32 %v1464_v31, %v1327_v35  ;;  %v3575_v30 = vadd.f32 %v1483_v38, %v1463_v32 }
0x12fa   :  { %v1331_v37 = vpop.f32.mrf.mxu0 }
0x12fb   :  { %v1469_v34 = vadd.f32 %v1468_v26, %v1331_v37  ;;  %v3577_v19 = vadd.f32 %v1487_v44, %v1465_v36  ;;  %v1506_v36 = vld [vmem:[%s3799_s1] sm:$0xff] }
0x12fc   :  { %v1333_v39 = vpop.f32.mrf.mxu0  ;;  %vm1507_vm10 = vcmp.gt.f32.partialorder %v1506_v36, 0.5 }
0x12fd   :  { %v1471_v0 = vadd.f32 %v1470_v17, %v1333_v39  ;;  %v3579_v13 = vadd.f32 %v1483_v38, %v1469_v34 }
0x12fe   :  { %v1337_v63 = vpop.f32.mrf.mxu0 }
0x12ff   :  { %v1475_v5 = vadd.f32 %v1474_v8, %v1337_v63  ;;  %v3581_v42 = vadd.f32 %v1487_v44, %v1471_v0 }
0x1300   :  { %v1339_v46 = vpop.f32.mrf.mxu0 }
0x1301   :  { %v1477_v48 = vadd.f32 %v1476_v43, %v1339_v46  ;;  %v3583_v1 = vadd.f32 %v1483_v38, %v1475_v5 }
0x1302   :  { %v1574_v28 = vpop.f32.mrf.mxu0 }
0x1303   :  { %v1579_v6 = vadd.f32 %v1574_v28, %v1490_v15  ;;  %v3585_v53 = vadd.f32 %v1487_v44, %v1477_v48 }
0x1304   :  { %v1576_v54 = vpop.f32.mrf.mxu0 }
0x1305   :  { %v1580_v57 = vadd.f32 %v1576_v54, %v1491_v52  ;;  %v1581_v7 = vsub.f32 0.0, %v1579_v6 }
0x1307   :  { %2690 = vtanh.f32 %v1580_v57  ;;  %v1583_v40 = vmul.f32 1.442695, %v1581_v7  ;;  %v1582_v29 = vsub.f32 0.0, %v1580_v57 }
0x1309   :  { %2692 = vpow2.f32 %v1583_v40  ;;  %v1585_v32 = vmul.f32 1.442695, %v1582_v29 }
0x1314   :  { %v2691_v58 = vpop.eup %2690 }
0x1315   :  { %1594 = vrot.lane.b32.xlu0 %v2691_v58, %s2791_s2 }
0x1316   :  { %v2693_v31 = vpop.eup %2692 }
0x1317   :  { %v1587_v59 = vadd.f32 1.0, %v2693_v31 }
0x1319   :  { %2694 = vrcp.f32 %v1587_v59 }
0x1326   :  { %v2695_v61 = vpop.eup %2694 }
0x1327   :  { %v1592_v15 = vmul.f32 0.0, %v2695_v61 }
0x1387   :  { %v1595_v38 = vpop.permute.xlu0 %1594 }
0x1388   :  { %v1597_v56 = vmul.f32 %v2695_v61, %v1595_v38 }
0x138a   :  { %1599 = vrot.lane.b32.xlu1 %v1597_v56, %s2791_s2 }
0x13fc   :  { %v1600_v44 = vpop.permute.xlu1 %1599 }
0x13fd   :  { %v1602_v60 = vadd.f32 %v1600_v44, %v1592_v15  ;;  %v1615_v15 = vld [vmem:[%s3799_s1 + $0x8] sm:$0xff] }
0x13fe   :  { %vm1616_vm11 = vcmp.gt.f32.partialorder %v1615_v15, 0.5 }
0x13ff   :  { %2696 = vtanh.f32 %v1602_v60  ;;  %1611 = vrot.lane.b32.xlu1 %v1602_v60, %s2791_s2 }
0x1400   :  { %2698 = vpow2.f32 %v1585_v32 }
0x140c   :  { %v2697_v26 = vpop.eup %2696 }
0x140d   :  { %1605 = vrot.lane.b32.xlu0 %v2697_v26, %s2791_s2  ;;  %v2699_v35 = vpop.eup %2698 }
0x140e   :  { %v1588_v17 = vadd.f32 1.0, %v2699_v35 }
0x1410   :  { %2700 = vrcp.f32 %v1588_v17 }
0x141d   :  { %v2701_v8 = vpop.eup %2700 }
0x1471   :  { %v1612_v37 = vpop.permute.xlu1 %1611 }
0x1472   :  { %v1614_v34 = vsel %vm1507_vm10, %v1612_v37, 0.0 }
0x1473   :  { %1705 = vrot.lane.b32.xlu1 %v1614_v34, %s2791_s2 }
0x147f   :  { %v1606_v39 = vpop.permute.xlu0 %1605 }
0x1480   :  { %v1608_v0 = vmul.f32 %v2701_v8, %v1606_v39 }
0x1482   :  { %v1609_v63 = vsel %vm1507_vm10, %v1608_v0, 0.0 }
0x1483   :  { %2553 = vmatmul.mubr.msk.f32.vlgmr.msra.gmra.mxu1 %vm205_vm2, %v1609_v63 }
0x1484   :  { %1869 = vmatpush1.msra.mxu1 %v3403_v4  ;;  %1916 = vmatprep.mubr.f32.mxu1 %v2790_v3 }
0x1485   :  { %1870 = vmatprep.subr.mxu1 %v3409_v9 }
0x1486   :  { %1871 = vmatpush1.msra.mxu1 %v3417_v14 }
0x1487   :  { %1872 = vmatprep.subr.mxu1 %v3422_v16 }
0x1488   :  { %1873 = vmatpush1.msra.mxu1 %v3429_v18 }
0x1489   :  { %1874 = vmatprep.subr.mxu1 %v3434_v20 }
0x148a   :  { %1875 = vmatpush1.msra.mxu1 %v3441_v21 }
0x148b   :  { %1876 = vmatprep.subr.mxu1 %v3446_v22 }
0x148c   :  { %1877 = vmatpush1.msra.mxu1 %v3453_v23 }
0x148d   :  { %1878 = vmatprep.subr.mxu1 %v3458_v24 }
0x148e   :  { %1879 = vmatpush1.msra.mxu1 %v3465_v25 }
0x148f   :  { %1880 = vmatprep.subr.mxu1 %v3470_v10 }
0x1490   :  { %1881 = vmatpush1.msra.mxu1 %v3477_v12 }
0x1491   :  { %1882 = vmatprep.subr.mxu1 %v3482_v49 }
0x1492   :  { %1883 = vmatpush1.msra.mxu1 %v3489_v50 }
0x1493   :  { %2100 = vmatprep.subr.mxu1 %v3388_v47 }
0x14e5   :  { %v1706_v40 = vpop.permute.xlu1 %1705 }
0x1543   :  { %v1686_v41 = vpop.f32.mrf.mxu1 }
0x1544   :  { %v1691_v5 = vadd.f32 %v1686_v41, %v3559_v45 }
0x1545   :  { %v1688_v43 = vpop.f32.mrf.mxu1 }
0x1546   :  { %v1692_v46 = vadd.f32 %v1688_v43, %v3561_v2  ;;  %v1693_v28 = vsub.f32 0.0, %v1691_v5 }
0x1548   :  { %2702 = vtanh.f32 %v1692_v46  ;;  %v1695_v6 = vmul.f32 1.442695, %v1693_v28  ;;  %v1694_v61 = vsub.f32 0.0, %v1692_v46 }
0x154a   :  { %2704 = vpow2.f32 %v1695_v6  ;;  %v1697_v38 = vmul.f32 1.442695, %v1694_v61 }
0x1555   :  { %v2703_v48 = vpop.eup %2702 }
0x1556   :  { %1710 = vrot.lane.b32.xlu0 %v2703_v48, %s2791_s2 }
0x1557   :  { %v2705_v52 = vpop.eup %2704 }
0x1558   :  { %v1699_v54 = vadd.f32 1.0, %v2705_v52 }
0x155a   :  { %2706 = vrcp.f32 %v1699_v54 }
0x1567   :  { %v2707_v57 = vpop.eup %2706 }
0x1568   :  { %v1708_v45 = vmul.f32 %v2707_v57, %v1706_v40 }
0x15c8   :  { %v1711_v58 = vpop.permute.xlu0 %1710 }
0x15c9   :  { %v1713_v7 = vmul.f32 %v2707_v57, %v1711_v58 }
0x15cb   :  { %1715 = vrot.lane.b32.xlu0 %v1713_v7, %s2791_s2  ;;  %v1731_v7 = vld [vmem:[%s3799_s1 + $0x10] sm:$0xff] }
0x15cc   :  { %vm1732_vm12 = vcmp.gt.f32.partialorder %v1731_v7, 0.5 }
0x163d   :  { %v1716_v31 = vpop.permute.xlu0 %1715 }
0x163e   :  { %v1718_v59 = vadd.f32 %v1716_v31, %v1708_v45 }
0x1640   :  { %2708 = vtanh.f32 %v1718_v59  ;;  %1727 = vrot.lane.b32.xlu0 %v1718_v59, %s2791_s2 }
0x1641   :  { %2710 = vpow2.f32 %v1697_v38 }
0x164d   :  { %v2709_v2 = vpop.eup %2708 }
0x164e   :  { %1721 = vrot.lane.b32.xlu1 %v2709_v2, %s2791_s2  ;;  %v2711_v56 = vpop.eup %2710 }
0x164f   :  { %v1700_v44 = vadd.f32 1.0, %v2711_v56 }
0x1651   :  { %2712 = vrcp.f32 %v1700_v44 }
0x165e   :  { %v2713_v29 = vpop.eup %2712 }
0x16b2   :  { %v1728_v60 = vpop.permute.xlu0 %1727 }
0x16b3   :  { %v1730_v26 = vsel %vm1616_vm11, %v1728_v60, %v1614_v34 }
0x16b4   :  { %1821 = vrot.lane.b32.xlu0 %v1730_v26, %s2791_s2 }
0x16c0   :  { %v1722_v32 = vpop.permute.xlu1 %1721 }
0x16c1   :  { %v1724_v35 = vmul.f32 %v2713_v29, %v1722_v32 }
0x16c3   :  { %v1725_v36 = vsel %vm1616_vm11, %v1724_v35, %v1609_v63 }
0x16c4   :  { %2554 = vmatmul.mubr.msk.f32.vlgmr.msra.gmra.mxu0 %vm205_vm2, %v1725_v36 }
0x16c5   :  { %1985 = vmatpush1.msra.mxu0 %v3403_v4  ;;  %2032 = vmatprep.mubr.f32.mxu0 %v2790_v3 }
0x16c6   :  { %1986 = vmatprep.subr.mxu0 %v3409_v9 }
0x16c7   :  { %1987 = vmatpush1.msra.mxu0 %v3417_v14 }
0x16c8   :  { %1988 = vmatprep.subr.mxu0 %v3422_v16 }
0x16c9   :  { %1989 = vmatpush1.msra.mxu0 %v3429_v18 }
0x16ca   :  { %1990 = vmatprep.subr.mxu0 %v3434_v20 }
0x16cb   :  { %1991 = vmatpush1.msra.mxu0 %v3441_v21 }
0x16cc   :  { %1992 = vmatprep.subr.mxu0 %v3446_v22 }
0x16cd   :  { %1993 = vmatpush1.msra.mxu0 %v3453_v23 }
0x16ce   :  { %1994 = vmatprep.subr.mxu0 %v3458_v24 }
0x16cf   :  { %1995 = vmatpush1.msra.mxu0 %v3465_v25 }
0x16d0   :  { %1996 = vmatprep.subr.mxu0 %v3470_v10 }
0x16d1   :  { %1997 = vmatpush1.msra.mxu0 %v3477_v12 }
0x16d2   :  { %1998 = vmatprep.subr.mxu0 %v3482_v49 }
0x16d3   :  { %1999 = vmatpush1.msra.mxu0 %v3489_v50 }
0x16d4   :  { %2216 = vmatprep.subr.mxu0 %v3388_v47 }
0x1726   :  { %v1822_v28 = vpop.permute.xlu0 %1821 }
0x1784   :  { %v1802_v17 = vpop.f32.mrf.mxu0 }
0x1785   :  { %v1807_v37 = vadd.f32 %v1802_v17, %v3563_v51 }
0x1786   :  { %v1804_v34 = vpop.f32.mrf.mxu0 }
0x1787   :  { %v1808_v8 = vadd.f32 %v1804_v34, %v3565_v55  ;;  %v1809_v0 = vsub.f32 0.0, %v1807_v37 }
0x1789   :  { %2714 = vtanh.f32 %v1808_v8  ;;  %v1811_v63 = vmul.f32 1.442695, %v1809_v0  ;;  %v1810_v54 = vsub.f32 0.0, %v1808_v8 }
0x178b   :  { %2716 = vpow2.f32 %v1811_v63  ;;  %v1813_v57 = vmul.f32 1.442695, %v1810_v54 }
0x1796   :  { %v2715_v39 = vpop.eup %2714 }
0x1797   :  { %1826 = vrot.lane.b32.xlu1 %v2715_v39, %s2791_s2 }
0x1798   :  { %v2717_v41 = vpop.eup %2716 }
0x1799   :  { %v1815_v5 = vadd.f32 1.0, %v2717_v41 }
0x179b   :  { %2718 = vrcp.f32 %v1815_v5  ;;  %v1847_v5 = vld [vmem:[%s3799_s1 + $0x18] sm:$0xff] }
0x179c   :  { %vm1848_vm13 = vcmp.gt.f32.partialorder %v1847_v5, 0.5 }
0x17a8   :  { %v2719_v43 = vpop.eup %2718 }
0x17a9   :  { %v1824_v51 = vmul.f32 %v2719_v43, %v1822_v28 }
0x1809   :  { %v1827_v46 = vpop.permute.xlu1 %1826 }
0x180a   :  { %v1829_v48 = vmul.f32 %v2719_v43, %v1827_v46 }
0x180c   :  { %1831 = vrot.lane.b32.xlu1 %v1829_v48, %s2791_s2 }
0x187e   :  { %v1832_v6 = vpop.permute.xlu1 %1831 }
0x187f   :  { %v1834_v52 = vadd.f32 %v1832_v6, %v1824_v51 }
0x1881   :  { %2720 = vtanh.f32 %v1834_v52  ;;  %1843 = vrot.lane.b32.xlu1 %v1834_v52, %s2791_s2 }
0x1882   :  { %2722 = vpow2.f32 %v1813_v57 }
0x188e   :  { %v2721_v55 = vpop.eup %2720 }
0x188f   :  { %1837 = vrot.lane.b32.xlu0 %v2721_v55, %s2791_s2  ;;  %v2723_v58 = vpop.eup %2722 }
0x1890   :  { %v1816_v40 = vadd.f32 1.0, %v2723_v58 }
0x1892   :  { %2724 = vrcp.f32 %v1816_v40 }
0x189f   :  { %v2725_v59 = vpop.eup %2724 }
0x18f3   :  { %v1844_v45 = vpop.permute.xlu1 %1843 }
0x18f4   :  { %v1846_v31 = vsel %vm1732_vm12, %v1844_v45, %v1730_v26 }
0x18f5   :  { %1937 = vrot.lane.b32.xlu1 %v1846_v31, %s2791_s2 }
0x1901   :  { %v1838_v2 = vpop.permute.xlu0 %1837 }
0x1902   :  { %v1840_v61 = vmul.f32 %v2725_v59, %v1838_v2 }
0x1904   :  { %v1841_v38 = vsel %vm1732_vm12, %v1840_v61, %v1725_v36 }
0x1905   :  { %2555 = vmatmul.mubr.msk.f32.vlgmr.msra.gmra.mxu1 %vm205_vm2, %v1841_v38 }
0x1906   :  { %2101 = vmatpush1.msra.mxu1 %v3403_v4  ;;  %2148 = vmatprep.mubr.f32.mxu1 %v2790_v3 }
0x1907   :  { %2102 = vmatprep.subr.mxu1 %v3409_v9 }
0x1908   :  { %2103 = vmatpush1.msra.mxu1 %v3417_v14 }
0x1909   :  { %2104 = vmatprep.subr.mxu1 %v3422_v16 }
0x190a   :  { %2105 = vmatpush1.msra.mxu1 %v3429_v18 }
0x190b   :  { %2106 = vmatprep.subr.mxu1 %v3434_v20 }
0x190c   :  { %2107 = vmatpush1.msra.mxu1 %v3441_v21 }
0x190d   :  { %2108 = vmatprep.subr.mxu1 %v3446_v22 }
0x190e   :  { %2109 = vmatpush1.msra.mxu1 %v3453_v23 }
0x190f   :  { %2110 = vmatprep.subr.mxu1 %v3458_v24 }
0x1910   :  { %2111 = vmatpush1.msra.mxu1 %v3465_v25 }
0x1911   :  { %2112 = vmatprep.subr.mxu1 %v3470_v10 }
0x1912   :  { %2113 = vmatpush1.msra.mxu1 %v3477_v12 }
0x1913   :  { %2114 = vmatprep.subr.mxu1 %v3482_v49 }
0x1914   :  { %2115 = vmatpush1.msra.mxu1 %v3489_v50 }
0x1915   :  { %2332 = vmatprep.subr.mxu1 %v3388_v47 }
0x1967   :  { %v1938_v47 = vpop.permute.xlu1 %1937 }
0x19c5   :  { %v1918_v56 = vpop.f32.mrf.mxu1 }
0x19c6   :  { %v1923_v15 = vadd.f32 %v1918_v56, %v3567_v27 }
0x19c7   :  { %v1920_v44 = vpop.f32.mrf.mxu1 }
0x19c8   :  { %v1924_v60 = vadd.f32 %v1920_v44, %v3569_v62  ;;  %v1925_v29 = vsub.f32 0.0, %v1923_v15 }
0x19ca   :  { %2726 = vtanh.f32 %v1924_v60  ;;  %v1927_v32 = vmul.f32 1.442695, %v1925_v29  ;;  %v1926_v0 = vsub.f32 0.0, %v1924_v60 }
0x19cc   :  { %2728 = vpow2.f32 %v1927_v32  ;;  %v1929_v63 = vmul.f32 1.442695, %v1926_v0  ;;  %v1963_v32 = vld [vmem:[%s3799_s1 + $0x20] sm:$0xff]  ;;  %v2079_v0 = vld [vmem:[%s3799_s1 + $0x28] sm:$0xff] }
0x19cd   :  { %vm1964_vm14 = vcmp.gt.f32.partialorder %v1963_v32, 0.5  ;;  %vm2080_vm15 = vcmp.gt.f32.partialorder %v2079_v0, 0.5 }
0x19d7   :  { %v2727_v26 = vpop.eup %2726 }
0x19d8   :  { %1942 = vrot.lane.b32.xlu0 %v2727_v26, %s2791_s2 }
0x19d9   :  { %v2729_v35 = vpop.eup %2728 }
0x19da   :  { %v1931_v36 = vadd.f32 1.0, %v2729_v35 }
0x19dc   :  { %2730 = vrcp.f32 %v1931_v36 }
0x19e9   :  { %v2731_v17 = vpop.eup %2730 }
0x19ea   :  { %v1940_v27 = vmul.f32 %v2731_v17, %v1938_v47 }
0x1a4a   :  { %v1943_v37 = vpop.permute.xlu0 %1942 }
0x1a4b   :  { %v1945_v34 = vmul.f32 %v2731_v17, %v1943_v37 }
0x1a4d   :  { %1947 = vrot.lane.b32.xlu0 %v1945_v34, %s2791_s2 }
0x1abf   :  { %v1948_v8 = vpop.permute.xlu0 %1947 }
0x1ac0   :  { %v1950_v39 = vadd.f32 %v1948_v8, %v1940_v27 }
0x1ac2   :  { %2732 = vtanh.f32 %v1950_v39  ;;  %1959 = vrot.lane.b32.xlu0 %v1950_v39, %s2791_s2 }
0x1ac3   :  { %2734 = vpow2.f32 %v1929_v63 }
0x1acf   :  { %v2733_v62 = vpop.eup %2732 }
0x1ad0   :  { %1953 = vrot.lane.b32.xlu1 %v2733_v62, %s2791_s2  ;;  %v2735_v41 = vpop.eup %2734 }
0x1ad1   :  { %v1932_v43 = vadd.f32 1.0, %v2735_v41 }
0x1ad3   :  { %2736 = vrcp.f32 %v1932_v43 }
0x1ae0   :  { %v2737_v28 = vpop.eup %2736 }
0x1b34   :  { %v1960_v46 = vpop.permute.xlu0 %1959 }
0x1b35   :  { %v1962_v48 = vsel %vm1848_vm13, %v1960_v46, %v1846_v31 }
0x1b36   :  { %2053 = vrot.lane.b32.xlu0 %v1962_v48, %s2791_s2 }
0x1b42   :  { %v1954_v51 = vpop.permute.xlu1 %1953 }
0x1b43   :  { %v1956_v6 = vmul.f32 %v2737_v28, %v1954_v51 }
0x1b45   :  { %v1957_v52 = vsel %vm1848_vm13, %v1956_v6, %v1841_v38 }
0x1b46   :  { %2556 = vmatmul.mubr.msk.f32.vlgmr.msra.gmra.mxu0 %vm205_vm2, %v1957_v52 }
0x1b47   :  { %2217 = vmatpush1.msra.mxu0 %v3403_v4  ;;  %2264 = vmatprep.mubr.f32.mxu0 %v2790_v3 }
0x1b48   :  { %2218 = vmatprep.subr.mxu0 %v3409_v9 }
0x1b49   :  { %2219 = vmatpush1.msra.mxu0 %v3417_v14 }
0x1b4a   :  { %2220 = vmatprep.subr.mxu0 %v3422_v16 }
0x1b4b   :  { %2221 = vmatpush1.msra.mxu0 %v3429_v18 }
0x1b4c   :  { %2222 = vmatprep.subr.mxu0 %v3434_v20 }
0x1b4d   :  { %2223 = vmatpush1.msra.mxu0 %v3441_v21 }
0x1b4e   :  { %2224 = vmatprep.subr.mxu0 %v3446_v22 }
0x1b4f   :  { %2225 = vmatpush1.msra.mxu0 %v3453_v23 }
0x1b50   :  { %2226 = vmatprep.subr.mxu0 %v3458_v24 }
0x1b51   :  { %2227 = vmatpush1.msra.mxu0 %v3465_v25 }
0x1b52   :  { %2228 = vmatprep.subr.mxu0 %v3470_v10 }
0x1b53   :  { %2229 = vmatpush1.msra.mxu0 %v3477_v12 }
0x1b54   :  { %2230 = vmatprep.subr.mxu0 %v3482_v49 }
0x1b55   :  { %2231 = vmatpush1.msra.mxu0 %v3489_v50 }
0x1b56   :  { %2572 = vmatprep.subr.mxu0 %v2790_v3 }
0x1ba8   :  { %v2054_v56 = vpop.permute.xlu0 %2053 }
0x1c06   :  { %v2034_v55 = vpop.f32.mrf.mxu0 }
0x1c07   :  { %v2039_v54 = vadd.f32 %v2034_v55, %v3571_v11 }
0x1c08   :  { %v2036_v57 = vpop.f32.mrf.mxu0 }
0x1c09   :  { %v2040_v58 = vadd.f32 %v2036_v57, %v3573_v33  ;;  %v2041_v40 = vsub.f32 0.0, %v2039_v54 }
0x1c0b   :  { %2738 = vtanh.f32 %v2040_v58  ;;  %v2043_v45 = vmul.f32 1.442695, %v2041_v40  ;;  %v2042_v60 = vsub.f32 0.0, %v2040_v58 }
0x1c0d   :  { %2740 = vpow2.f32 %v2043_v45  ;;  %v2045_v26 = vmul.f32 1.442695, %v2042_v60 }
0x1c18   :  { %v2739_v7 = vpop.eup %2738 }
0x1c19   :  { %2058 = vrot.lane.b32.xlu1 %v2739_v7, %s2791_s2 }
0x1c1a   :  { %v2741_v31 = vpop.eup %2740 }
0x1c1b   :  { %v2047_v59 = vadd.f32 1.0, %v2741_v31 }
0x1c1d   :  { %2742 = vrcp.f32 %v2047_v59 }
0x1c2a   :  { %v2743_v2 = vpop.eup %2742 }
0x1c2b   :  { %v2056_v11 = vmul.f32 %v2743_v2, %v2054_v56 }
0x1c8b   :  { %v2059_v61 = vpop.permute.xlu1 %2058 }
0x1c8c   :  { %v2061_v38 = vmul.f32 %v2743_v2, %v2059_v61 }
0x1c8e   :  { %2063 = vrot.lane.b32.xlu1 %v2061_v38, %s2791_s2 }
0x1d00   :  { %v2064_v15 = vpop.permute.xlu1 %2063 }
0x1d01   :  { %v2066_v44 = vadd.f32 %v2064_v15, %v2056_v11 }
0x1d03   :  { %2744 = vtanh.f32 %v2066_v44  ;;  %2075 = vrot.lane.b32.xlu1 %v2066_v44, %s2791_s2  ;;  %v2195_v44 = vld [vmem:[%s3799_s1 + $0x30] sm:$0xff] }
0x1d04   :  { %2746 = vpow2.f32 %v2045_v26  ;;  %vm2196_vm0 = vcmp.gt.f32.partialorder %v2195_v44, 0.5 }
0x1d10   :  { %v2745_v33 = vpop.eup %2744 }
0x1d11   :  { %2069 = vrot.lane.b32.xlu0 %v2745_v33, %s2791_s2  ;;  %v2747_v29 = vpop.eup %2746 }
0x1d12   :  { %v2048_v35 = vadd.f32 1.0, %v2747_v29 }
0x1d14   :  { %2748 = vrcp.f32 %v2048_v35 }
0x1d21   :  { %v2749_v37 = vpop.eup %2748 }
0x1d75   :  { %v2076_v36 = vpop.permute.xlu1 %2075 }
0x1d76   :  { %v2078_v17 = vsel %vm1964_vm14, %v2076_v36, %v1962_v48 }
0x1d77   :  { %2169 = vrot.lane.b32.xlu1 %v2078_v17, %s2791_s2 }
0x1d83   :  { %v2070_v34 = vpop.permute.xlu0 %2069 }
0x1d84   :  { %v2072_v47 = vmul.f32 %v2749_v37, %v2070_v34 }
0x1d86   :  { %v2073_v27 = vsel %vm1964_vm14, %v2072_v47, %v1957_v52 }
0x1d87   :  { %2557 = vmatmul.mubr.msk.f32.vlgmr.msra.gmra.mxu1 %vm205_vm2, %v2073_v27 }
0x1d88   :  { %2333 = vmatpush1.msra.mxu1 %v3403_v4  ;;  %2380 = vmatprep.mubr.f32.mxu1 %v2790_v3 }
0x1d89   :  { %2334 = vmatprep.subr.mxu1 %v3409_v9 }
0x1d8a   :  { %2335 = vmatpush1.msra.mxu1 %v3417_v14 }
0x1d8b   :  { %2336 = vmatprep.subr.mxu1 %v3422_v16 }
0x1d8c   :  { %2337 = vmatpush1.msra.mxu1 %v3429_v18 }
0x1d8d   :  { %2338 = vmatprep.subr.mxu1 %v3434_v20 }
0x1d8e   :  { %2339 = vmatpush1.msra.mxu1 %v3441_v21 }
0x1d8f   :  { %2340 = vmatprep.subr.mxu1 %v3446_v22 }
0x1d90   :  { %2341 = vmatpush1.msra.mxu1 %v3453_v23 }
0x1d91   :  { %2342 = vmatprep.subr.mxu1 %v3458_v24 }
0x1d92   :  { %2343 = vmatpush1.msra.mxu1 %v3465_v25 }
0x1d93   :  { %2344 = vmatprep.subr.mxu1 %v3470_v10 }
0x1d94   :  { %2345 = vmatpush1.msra.mxu1 %v3477_v12 }
0x1d95   :  { %2346 = vmatprep.subr.mxu1 %v3482_v49 }
0x1d96   :  { %2347 = vmatpush1.msra.mxu1 %v3489_v50 }
0x1de9   :  { %v2170_v12 = vpop.permute.xlu1 %2169 }
0x1e47   :  { %v2150_v4 = vpop.f32.mrf.mxu1 }
0x1e48   :  { %v2155_v9 = vadd.f32 %v2150_v4, %v3575_v30 }
0x1e49   :  { %v2152_v14 = vpop.f32.mrf.mxu1 }
0x1e4a   :  { %v2156_v16 = vadd.f32 %v2152_v14, %v3577_v19  ;;  %v2157_v20 = vsub.f32 0.0, %v2155_v9 }
0x1e4c   :  { %2750 = vtanh.f32 %v2156_v16  ;;  %v2159_v21 = vmul.f32 1.442695, %v2157_v20  ;;  %v2158_v8 = vsub.f32 0.0, %v2156_v16 }
0x1e4e   :  { %2752 = vpow2.f32 %v2159_v21  ;;  %v2161_v39 = vmul.f32 1.442695, %v2158_v8 }
0x1e59   :  { %v2751_v18 = vpop.eup %2750 }
0x1e5a   :  { %2174 = vrot.lane.b32.xlu0 %v2751_v18, %s2791_s2 }
0x1e5b   :  { %v2753_v22 = vpop.eup %2752 }
0x1e5c   :  { %v2163_v23 = vadd.f32 1.0, %v2753_v22  ;;  %v2427_v22 = vld [vmem:[%s3801_s4 + $0x28] sm:$0xff] }
0x1e5e   :  { %2754 = vrcp.f32 %v2163_v23  ;;  %v2426_v23 = vld [vmem:[%s3801_s4 + $0x20] sm:$0xff] }
0x1e6b   :  { %v2755_v24 = vpop.eup %2754 }
0x1e6c   :  { %v2172_v49 = vmul.f32 %v2755_v24, %v2170_v12 }
0x1ecc   :  { %v2175_v25 = vpop.permute.xlu0 %2174 }
0x1ecd   :  { %v2177_v10 = vmul.f32 %v2755_v24, %v2175_v25  ;;  %v2425_v24 = vld [vmem:[%s3801_s4 + $0x18] sm:$0xff]  ;;  %v2424_v25 = vld [vmem:[%s3801_s4 + $0x10] sm:$0xff] }
0x1ecf   :  { %2179 = vrot.lane.b32.xlu0 %v2177_v10, %s2791_s2 }
0x1f41   :  { %v2180_v50 = vpop.permute.xlu0 %2179 }
0x1f42   :  { %v2182_v30 = vadd.f32 %v2180_v50, %v2172_v49 }
0x1f44   :  { %2756 = vtanh.f32 %v2182_v30  ;;  %2191 = vrot.lane.b32.xlu0 %v2182_v30, %s2791_s2  ;;  %v2423_v30 = vld [vmem:[%s3801_s4 + $0x8] sm:$0xff] }
0x1f45   :  { %2758 = vpow2.f32 %v2161_v39 }
0x1f51   :  { %v2757_v19 = vpop.eup %2756 }
0x1f52   :  { %2185 = vrot.lane.b32.xlu1 %v2757_v19, %s2791_s2  ;;  %v2759_v62 = vpop.eup %2758  ;;  %v2422_v19 = vld [vmem:[%s3801_s4] sm:$0xff] }
0x1f53   :  { %v2164_v63 = vadd.f32 1.0, %v2759_v62 }
0x1f55   :  { %2760 = vrcp.f32 %v2164_v63 }
0x1f62   :  { %v2761_v43 = vpop.eup %2760 }
0x1fb6   :  { %v2192_v41 = vpop.permute.xlu0 %2191 }
0x1fb7   :  { %v2194_v5 = vsel %vm2080_vm15, %v2192_v41, %v2078_v17  ;;  %v2311_v41 = vld [vmem:[%s3799_s1 + $0x38] sm:$0xff] }
0x1fb8   :  { %2285 = vrot.lane.b32.xlu0 %v2194_v5, %s2791_s2  ;;  %vm2312_vm3 = vcmp.gt.f32.partialorder %v2311_v41, 0.5 }
0x1fc4   :  { %v2186_v46 = vpop.permute.xlu1 %2185 }
0x1fc5   :  { %v2188_v48 = vmul.f32 %v2761_v43, %v2186_v46 }
0x1fc7   :  { %v2189_v28 = vsel %vm2080_vm15, %v2188_v48, %v2073_v27 }
0x1fc8   :  { %2558 = vmatmul.mubr.msk.f32.vlgmr.msra.gmra.mxu0 %vm205_vm2, %v2189_v28 }
0x1fc9   :  { %2588 = vmatprep.mubr.msk.f32.mxu0 %vm2792_vm1, %v2790_v3 }
0x202a   :  { %v2286_v2 = vpop.permute.xlu0 %2285 }
0x2088   :  { %v2266_v51 = vpop.f32.mrf.mxu0 }
0x2089   :  { %v2271_v6 = vadd.f32 %v2266_v51, %v3579_v13 }
0x208a   :  { %v2268_v52 = vpop.f32.mrf.mxu0 }
0x208b   :  { %v2272_v55 = vadd.f32 %v2268_v52, %v3581_v42  ;;  %v2273_v57 = vsub.f32 0.0, %v2271_v6 }
0x208d   :  { %2762 = vtanh.f32 %v2272_v55  ;;  %v2275_v58 = vmul.f32 1.442695, %v2273_v57  ;;  %v2274_v56 = vsub.f32 0.0, %v2272_v55 }
0x208f   :  { %2764 = vpow2.f32 %v2275_v58  ;;  %v2277_v11 = vmul.f32 1.442695, %v2274_v56 }
0x209a   :  { %v2763_v54 = vpop.eup %2762 }
0x209b   :  { %2290 = vrot.lane.b32.xlu1 %v2763_v54, %s2791_s2 }
0x209c   :  { %v2765_v7 = vpop.eup %2764 }
0x209d   :  { %v2279_v40 = vadd.f32 1.0, %v2765_v7 }
0x209f   :  { %2766 = vrcp.f32 %v2279_v40 }
0x20ac   :  { %v2767_v45 = vpop.eup %2766 }
0x20ad   :  { %v2288_v13 = vmul.f32 %v2767_v45, %v2286_v2 }
0x210d   :  { %v2291_v31 = vpop.permute.xlu1 %2290 }
0x210e   :  { %v2293_v59 = vmul.f32 %v2767_v45, %v2291_v31 }
0x2110   :  { %2295 = vrot.lane.b32.xlu1 %v2293_v59, %s2791_s2 }
0x2182   :  { %v2296_v61 = vpop.permute.xlu1 %2295 }
0x2183   :  { %v2298_v38 = vadd.f32 %v2296_v61, %v2288_v13 }
0x2185   :  { %2768 = vtanh.f32 %v2298_v38  ;;  %2307 = vrot.lane.b32.xlu1 %v2298_v38, %s2791_s2 }
0x2186   :  { %2770 = vpow2.f32 %v2277_v11 }
0x2192   :  { %v2769_v42 = vpop.eup %2768 }
0x2193   :  { %2301 = vrot.lane.b32.xlu0 %v2769_v42, %s2791_s2  ;;  %v2771_v15 = vpop.eup %2770 }
0x2194   :  { %v2280_v33 = vadd.f32 1.0, %v2771_v15 }
0x2196   :  { %2772 = vrcp.f32 %v2280_v33 }
0x21a3   :  { %v2773_v29 = vpop.eup %2772 }
0x21f7   :  { %v2308_v60 = vpop.permute.xlu1 %2307 }
0x21f8   :  { %v2310_v26 = vsel %vm2196_vm0, %v2308_v60, %v2194_v5 }
0x21f9   :  { %2401 = vrot.lane.b32.xlu1 %v2310_v26, %s2791_s2 }
0x2205   :  { %v2302_v32 = vpop.permute.xlu0 %2301 }
0x2206   :  { %v2304_v35 = vmul.f32 %v2773_v29, %v2302_v32 }
0x2208   :  { %v3745_v36 = vsel %vm2196_vm0, %v2304_v35, %v2189_v28 }
0x2209   :  { %2559 = vmatmul.mubr.msk.f32.vlgmr.msra.gmra.mxu1 %vm205_vm2, %v3745_v36 }
0x226b   :  { %v2402_v10 = vpop.permute.xlu1 %2401 }
0x22c9   :  { %v2382_v17 = vpop.f32.mrf.mxu1 }
0x22ca   :  { %v2387_v37 = vadd.f32 %v2382_v17, %v3583_v1  ;;  %v2429_v1 = vld [vmem:[%s3801_s4 + $0x38] sm:$0xff] }
0x22cb   :  { %v2384_v34 = vpop.f32.mrf.mxu1  ;;  %2573 = vmatpush3.msra.mxu0 %v2429_v1 }
0x22cc   :  { %v2388_v47 = vadd.f32 %v2384_v34, %v3585_v53  ;;  %v2389_v4 = vsub.f32 0.0, %v2387_v37  ;;  %v2428_v53 = vld [vmem:[%s3801_s4 + $0x30] sm:$0xff]  ;;  %2574 = vmatprep.subr.mxu0 %v2790_v3 }
0x22cd   :  { %2575 = vmatpush3.msra.mxu0 %v2428_v53 }
0x22ce   :  { %2774 = vtanh.f32 %v2388_v47  ;;  %v2391_v9 = vmul.f32 1.442695, %v2389_v4  ;;  %2576 = vmatprep.subr.mxu0 %v2790_v3  ;;  %v2390_v39 = vsub.f32 0.0, %v2388_v47 }
0x22cf   :  { %2577 = vmatpush3.msra.mxu0 %v2427_v22 }
0x22d0   :  { %2776 = vpow2.f32 %v2391_v9  ;;  %2578 = vmatprep.subr.mxu0 %v2790_v3  ;;  %v2393_v62 = vmul.f32 1.442695, %v2390_v39 }
0x22d1   :  { %2579 = vmatpush3.msra.mxu0 %v2426_v23 }
0x22d2   :  { %2580 = vmatprep.subr.mxu0 %v2790_v3 }
0x22d3   :  { %2581 = vmatpush3.msra.mxu0 %v2425_v24 }
0x22d4   :  { %2582 = vmatprep.subr.mxu0 %v2790_v3 }
0x22d5   :  { %2583 = vmatpush3.msra.mxu0 %v2424_v25 }
0x22d6   :  { %2584 = vmatprep.subr.mxu0 %v2790_v3 }
0x22d7   :  { %2585 = vmatpush3.msra.mxu0 %v2423_v30 }
0x22d8   :  { %2586 = vmatprep.subr.mxu0 %v2790_v3  ;;  %v2560_v3 = vld [vmem:[%s3801_s4 + $0x40] ss:$0 sm:$0xff] }
0x22d9   :  { %2587 = vmatpush3.msra.mxu0 %v2422_v19 }
0x22db   :  { %v2775_v27 = vpop.eup %2774 }
0x22dc   :  { %2406 = vrot.lane.b32.xlu0 %v2775_v27, %s2791_s2 }
0x22dd   :  { %v2777_v14 = vpop.eup %2776 }
0x22de   :  { %v2395_v16 = vadd.f32 1.0, %v2777_v14 }
0x22e0   :  { %2778 = vrcp.f32 %v2395_v16 }
0x22ed   :  { %v2779_v18 = vpop.eup %2778 }
0x22ee   :  { %v2404_v12 = vmul.f32 %v2779_v18, %v2402_v10 }
0x234e   :  { %v2407_v20 = vpop.permute.xlu0 %2406 }
0x234f   :  { %v2409_v21 = vmul.f32 %v2779_v18, %v2407_v20 }
0x2351   :  { %2411 = vrot.lane.b32.xlu0 %v2409_v21, %s2791_s2 }
0x23c3   :  { %v2412_v49 = vpop.permute.xlu0 %2411 }
0x23c4   :  { %v2414_v50 = vadd.f32 %v2412_v49, %v2404_v12 }
0x23c6   :  { %2780 = vtanh.f32 %v2414_v50 }
0x23c7   :  { %2782 = vpow2.f32 %v2393_v62 }
0x23d3   :  { %v2781_v8 = vpop.eup %2780 }
0x23d4   :  { %2417 = vrot.lane.b32.xlu1 %v2781_v8, %s2791_s2  ;;  %v2783_v0 = vpop.eup %2782 }
0x23d5   :  { %v2396_v63 = vadd.f32 1.0, %v2783_v0 }
0x23d7   :  { %2784 = vrcp.f32 %v2396_v63 }
0x23e4   :  { %v2785_v5 = vpop.eup %2784 }
0x2446   :  { %v2418_v43 = vpop.permute.xlu1 %2417 }
0x2447   :  { %v2420_v46 = vmul.f32 %v2785_v5, %v2418_v43 }
0x2449   :  { %v2421_v48 = vsel %vm2312_vm3, %v2420_v46, %v3745_v36 }
0x244a   :  { %2589 = vmatmul.mubr.msk.f32.vlgmr.msra.gmra.mxu0 %vm205_vm2, %v2421_v48 }
0x250a   :  { %v2504_v28 = vpop.f32.mrf.mxu0 }
0x250b   :  { %v2505_v51 = vadd.f32 %v2560_v3, %v2504_v28 }
0x250c   :  { %v2590_v6 = vpop.f32.mrf.mxu0 }
0x250d   :  { %v2562_v52 = vmul.f32 -1.442695, %v2505_v51 }
0x250f   :  { %2786 = vpow2.f32 %v2562_v52 }
0x251c   :  { %v2787_v55 = vpop.eup %2786 }
0x251d   :  { %v2511_v54 = vadd.f32 1.0, %v2787_v55 }
0x251f   :  { %2788 = vrcp.f32 %v2511_v54 }
0x252c   :  { %v2789_v57 = vpop.eup %2788 }
0x252d   :  { %2515 = vst.msk [vmem:[%s3802_s5] sm:$0xff] %vm2514_vm4, %v2789_v57 }

</bundles_post_ra>
